<compile_context>
chip_gen: v6e
topology: v6e:2x2x1
jax: 0.10.0
libtpu: 0.0.40
codegen_flags: <defaults>
</compile_context>

<pallas_src>
import jax
import jax.numpy as jnp
from jax.experimental import pallas as pl
from jax.experimental.pallas import tpu as pltpu

# ---- model hyper-parameters (small, consistent with the module __init__) ----
D_MODEL = 32
D_INNER = 64
N_HEAD = 2
D_K = 16
D_V = 16
N_TAYLOR = 3
LN_EPS = 1e-5

# rows of the packed 1-row-parameter array (shape (16, 128), f32)
VEC_BQK, VEC_BV, VEC_BO = 0, 1, 2
VEC_G1, VEC_BE1, VEC_G2, VEC_BE2 = 3, 4, 5, 6
VEC_B1, VEC_B2 = 7, 8
VEC_ROWS, VEC_LANES = 16, 128


def _layernorm(x, gamma, beta):
    mu = jnp.mean(x, axis=-1, keepdims=True)
    var = jnp.mean((x - mu) ** 2, axis=-1, keepdims=True)
    return (x - mu) * jax.lax.rsqrt(var + LN_EPS) * gamma + beta


def _to_lane_dense(x2d, rows, cols):
    """Relayout a (r0, c0) value into the lane-dense (rows, cols) store layout.

    Preserves row-major element order and uses only major-dim reshapes, static
    slices and lane concatenation (cheap, well-supported Mosaic ops).
    """
    r0, c0 = x2d.shape
    if c0 == cols and r0 == rows:
        return x2d
    if cols % c0 == 0:
        group = cols // c0
        xg = x2d.reshape(rows, group, c0)                 # major-dim split only
        return jnp.concatenate([xg[:, i, :] for i in range(group)], axis=-1)
    return x2d.reshape(rows, cols)                        # generic fallback


def encoder_layer_kernel(
    enc_in_ref, ev_emb_ref, time_ref, amask_ref, npad_ref,
    wqk_ref, wv_ref, wo_ref, w1_ref, w2_ref, vec_ref,
    out_ref, attn_ref,
):
    Bblk, L, D = enc_in_ref.shape
    M = Bblk * L

    x = enc_in_ref[...].reshape(M, D)           # (M, D)  f32  enc_input
    e_bf = ev_emb_ref[...].reshape(M, D)        # (M, D)  bf16 event_emb
    t3 = time_ref[...]                          # (Bblk, L, 1) f32 enc_time
    npad = npad_ref[...].reshape(M, 1)          # (M, 1)  f32

    vec = vec_ref[...]                          # (16, 128) packed 1-row params
    bqk = vec[VEC_BQK:VEC_BQK + 1, :2 * N_HEAD * D_K]
    bv = vec[VEC_BV:VEC_BV + 1, :N_HEAD * D_V]
    bo = vec[VEC_BO:VEC_BO + 1, :D]
    g1 = vec[VEC_G1:VEC_G1 + 1, :D]
    be1 = vec[VEC_BE1:VEC_BE1 + 1, :D]
    g2 = vec[VEC_G2:VEC_G2 + 1, :D]
    be2 = vec[VEC_BE2:VEC_BE2 + 1, :D]
    b1 = vec[VEC_B1:VEC_B1 + 1, :D_INNER]
    b2 = vec[VEC_B2:VEC_B2 + 1, :D]

    # ---- ln_1 (normalize_before=True): enc_input = LN(enc_input) ----
    # The module reassigns enc_input to its normalized value, so the attention
    # residual is intentionally against the *normalized* input.
    x_ln = _layernorm(x, g1, be1)               # f32 (M, D)
    xln_bf = x_ln.astype(jnp.bfloat16)

    # ---- self.slf_attn(event_emb, event_emb, enc_input, enc_time, ...) ----
    # TODO(synk): HeatDiffusionAttention source is not provided; reconstructed as
    # masked multi-head attention (q=k=event_emb, v=normalized enc_input) followed
    # by a num_taylor_terms Taylor expansion of exp(t*(A - I)) applied to the
    # values. event_type / clamp / decaying flags are unused in this reconstruction.

    # Fused projections: one (M,32)x(32,64) matmul for Q|K, one (M,32)x(32,32) for V.
    qk = jnp.dot(e_bf, wqk_ref[...], preferred_element_type=jnp.float32) + bqk
    v_all = jnp.dot(xln_bf, wv_ref[...], preferred_element_type=jnp.float32) + bv

    # Head split -> head-major batched tensors (N_HEAD*Bblk, L, d).
    q_b = jnp.concatenate(
        [qk[:, h * D_K:(h + 1) * D_K].reshape(Bblk, L, D_K) for h in range(N_HEAD)],
        axis=0)
    k_off = N_HEAD * D_K
    k_b = jnp.concatenate(
        [qk[:, k_off + h * D_K:k_off + (h + 1) * D_K].reshape(Bblk, L, D_K)
         for h in range(N_HEAD)], axis=0)
    v_b = jnp.concatenate(
        [v_all[:, h * D_V:(h + 1) * D_V].reshape(Bblk, L, D_V) for h in range(N_HEAD)],
        axis=0)

    # Mask / time replicated once over the head batch (single compare+select below).
    amask_b = jnp.concatenate([amask_ref[...]] * N_HEAD, axis=0)   # (H*Bblk, L, L) bf16
    t_b = jnp.concatenate([t3] * N_HEAD, axis=0)                   # (H*Bblk, L, 1) f32

    # Single scores einsum / masked softmax for all heads and sequences of the block.
    scale = 1.0 / (float(D_K) ** 0.5)
    scores = jnp.einsum('bld,bmd->blm',
                        q_b.astype(jnp.bfloat16), k_b.astype(jnp.bfloat16),
                        preferred_element_type=jnp.float32) * scale
    scores = jnp.where(amask_b > 0.5, -1e9, scores)
    mx = jnp.max(scores, axis=-1, keepdims=True)
    p = jnp.exp(scores - mx)
    denom = jnp.sum(p, axis=-1, keepdims=True)
    a = p * pl.reciprocal(denom, approx=True)                      # (H*Bblk, L, L)
    a_bf = a.astype(jnp.bfloat16)

    # Attention weights: single bf16 lane-dense store for the whole batch block.
    a2 = a_bf.reshape(N_HEAD * Bblk * L, L)
    attn_ref[...] = _to_lane_dense(
        a2, attn_ref.shape[1], attn_ref.shape[2]).reshape(attn_ref.shape)

    # Taylor heat kernel: sum_{m=0}^{M-1} t^m/m! * (A - I)^m @ v, one batched recursion.
    term = v_b
    out_b = term
    t_pow = t_b
    inv_f = 1.0
    for mdeg in range(1, N_TAYLOR):
        term = jnp.einsum('blm,bmd->bld', a_bf, term.astype(jnp.bfloat16),
                          preferred_element_type=jnp.float32) - term
        inv_f = inv_f / mdeg                                       # compile-time 1/m!
        out_b = out_b + (t_pow * inv_f) * term
        if mdeg + 1 < N_TAYLOR:
            t_pow = t_pow * t_b

    # O_h as a single (M, n_head*d_v) x (n_head*d_v, d_model) matmul on the
    # lane-concatenated head outputs, plus bias and residual against x_ln.
    heads_cat = jnp.concatenate(
        [out_b[h * Bblk:(h + 1) * Bblk].reshape(M, D_V) for h in range(N_HEAD)],
        axis=-1)                                                   # (M, n_head*d_v)
    enc = x_ln + bo + jnp.dot(heads_cat.astype(jnp.bfloat16), wo_ref[...],
                              preferred_element_type=jnp.float32)
    enc = enc * npad

    # ---- ln_2 + position-wise feed-forward, residual, pad mask ----
    # TODO(synk): PositionwiseFeedForward source is not provided; implemented as
    # w_2(gelu(w_1(x))) (tanh-approx gelu); residual handled by the outer layer.
    resid = enc
    hdn = _layernorm(enc, g2, be2)
    hdn = jnp.dot(hdn.astype(jnp.bfloat16), w1_ref[...],
                  preferred_element_type=jnp.float32) + b1
    hdn = jax.nn.gelu(hdn, approximate=True)
    hdn = jnp.dot(hdn.astype(jnp.bfloat16), w2_ref[...],
                  preferred_element_type=jnp.float32) + b2
    out = (hdn + resid) * npad                                     # (M, D) f32

    out_ref[...] = _to_lane_dense(
        out, out_ref.shape[1], out_ref.shape[2]).reshape(out_ref.shape)


def _pick_bblk(B, L, target_rows=1024, io_budget_bytes=16 * 1024 * 1024):
    """Largest divisor of B such that
       * M = Bblk*L stays <= target_rows (amortize ~0.35us per-grid-step overhead),
       * the grid keeps >= 2 steps when B >= 2 (v7x has two TensorCores),
       * double-buffered per-block I/O fits a conservative VMEM budget."""
    def io_bytes(bblk):
        per_seq = (L * D_MODEL * 4        # enc_input f32
                   + L * D_MODEL * 2      # event_emb bf16
                   + L * 4                # enc_time
                   + L * L * 2            # mask bf16
                   + L * 4                # non_pad_mask
                   + L * D_MODEL * 4      # out f32
                   + N_HEAD * L * L * 2)  # attn bf16
        return 2 * bblk * per_seq
    best = 1
    for cand in range(1, B + 1):
        if B % cand:
            continue
        if cand * L > max(target_rows, L):
            continue
        if B >= 2 and B // cand < 2:
            continue
        if io_bytes(cand) > io_budget_bytes:
            continue
        best = max(best, cand)
    return best


def _vmem_limit_bytes():
    # ~48 MiB on v7x (64 MiB physical per TC), up to ~96 MiB on v5e/v6e (128 MiB).
    try:
        cap = pltpu.get_tpu_info().vmem_capacity_bytes
        return int(min(100 * 1024 * 1024, max(32 * 1024 * 1024, (cap * 3) // 4)))
    except Exception:
        return 48 * 1024 * 1024


def _dense_rc(total, fallback_rows, fallback_cols):
    """(rows, 128) lane-dense layout when possible, otherwise the natural layout."""
    if total % 128 == 0:
        return total // 128, 128
    return fallback_rows, fallback_cols


def _cost_estimate(B, L):
    M = B * L
    flops = (2 * M * D_MODEL * (2 * N_HEAD * D_K)             # fused Q|K proj
             + 2 * M * D_MODEL * (N_HEAD * D_V)               # V proj
             + 2 * B * N_HEAD * L * L * D_K                   # scores
             + (N_TAYLOR - 1) * 2 * B * N_HEAD * L * L * D_V  # Taylor matmuls
             + 2 * M * (N_HEAD * D_V) * D_MODEL               # O_h
             + 2 * M * D_MODEL * D_INNER                      # ffn w1
             + 2 * M * D_INNER * D_MODEL)                     # ffn w2
    transcendentals = B * N_HEAD * L * L + M * D_INNER + 2 * M
    weight_bytes = 2 * (D_MODEL * 2 * N_HEAD * D_K + D_MODEL * N_HEAD * D_V
                        + N_HEAD * D_V * D_MODEL + D_MODEL * D_INNER
                        + D_INNER * D_MODEL) + VEC_ROWS * VEC_LANES * 4
    io_bytes = (M * D_MODEL * 4 + M * D_MODEL * 2 + M * 4 + B * L * L * 2 + M * 4
                + M * D_MODEL * 4 + B * N_HEAD * L * L * 2)
    return pl.CostEstimate(flops=flops, transcendentals=transcendentals,
                           bytes_accessed=io_bytes + weight_bytes)


def encoder_layer(enc_input, event_emb, enc_time, non_pad_mask, slf_attn_mask,
                  params, *, block_b=None):
    B, L, D = enc_input.shape
    assert D == D_MODEL

    Bblk = block_b if block_b is not None else _pick_bblk(B, L)
    assert B % Bblk == 0
    grid_n = B // Bblk

    # ---- host-side parameter repacking (trace-time; free at kernel runtime) ----
    wqk = jnp.concatenate([params["wq"], params["wk"]], axis=1).astype(jnp.bfloat16)
    wv = params["wv"].astype(jnp.bfloat16)
    wo = params["wo"].astype(jnp.bfloat16)
    w1 = params["w1"].astype(jnp.bfloat16)
    w2 = params["w2"].astype(jnp.bfloat16)

    vec = jnp.zeros((VEC_ROWS, VEC_LANES), jnp.float32)
    for row, p in [
        (VEC_BQK, jnp.concatenate([params["bq"], params["bk"]], axis=1)),
        (VEC_BV, params["bv"]), (VEC_BO, params["bo"]),
        (VEC_G1, params["g1"]), (VEC_BE1, params["be1"]),
        (VEC_G2, params["g2"]), (VEC_BE2, params["be2"]),
        (VEC_B1, params["b1"]), (VEC_B2, params["b2"]),
    ]:
        flat = p.reshape(-1).astype(jnp.float32)
        vec = vec.at[row, : flat.shape[0]].set(flat)

    # cheaper HBM reads: bf16 event_emb (matmul-only operand) and bf16 mask
    event_emb_bf = event_emb.astype(jnp.bfloat16)
    mask_bf = slf_attn_mask.astype(jnp.bfloat16)

    # lane-dense output layouts (last dim a multiple of 128 when possible)
    out_rows, out_cols = _dense_rc(Bblk * L * D_MODEL, Bblk * L, D_MODEL)
    attn_rows, attn_cols = _dense_rc(N_HEAD * Bblk * L * L, N_HEAD * Bblk * L, L)

    def data_spec(shape_tail):
        return pl.BlockSpec((Bblk,) + shape_tail,
                            lambda b: (b,) + (0,) * len(shape_tail))

    def rep_spec(shape):
        zeros = (0,) * len(shape)
        return pl.BlockSpec(shape, lambda b: zeros)

    in_specs = [
        data_spec((L, D)),          # enc_input (f32)
        data_spec((L, D)),          # event_emb (bf16)
        data_spec((L, 1)),          # enc_time (f32)
        data_spec((L, L)),          # slf_attn_mask (bf16)
        data_spec((L, 1)),          # non_pad_mask (f32)
        rep_spec(wqk.shape),
        rep_spec(wv.shape),
        rep_spec(wo.shape),
        rep_spec(w1.shape),
        rep_spec(w2.shape),
        rep_spec(vec.shape),
    ]
    out_shape = (
        jax.ShapeDtypeStruct((grid_n, out_rows, out_cols), jnp.float32),
        jax.ShapeDtypeStruct((grid_n, attn_rows, attn_cols), jnp.bfloat16),
    )
    out_specs = (
        pl.BlockSpec((1, out_rows, out_cols), lambda b: (b, 0, 0)),
        pl.BlockSpec((1, attn_rows, attn_cols), lambda b: (b, 0, 0)),
    )

    fn = pl.pallas_call(
        encoder_layer_kernel,
        out_shape=out_shape,
        grid_spec=pltpu.PrefetchScalarGridSpec(
            num_scalar_prefetch=0,
            grid=(grid_n,),
            in_specs=in_specs,
            out_specs=out_specs,
        ),
        compiler_params=pltpu.CompilerParams(
            dimension_semantics=("parallel",),   # batch blocks are independent
            vmem_limit_bytes=_vmem_limit_bytes(),
        ),
        cost_estimate=_cost_estimate(B, L),
    )
    out_flat, attn_flat = fn(enc_input, event_emb_bf, enc_time, mask_bf, non_pad_mask,
                             wqk, wv, wo, w1, w2, vec)

    # undo the lane-dense store layouts (layout plumbing only; order is preserved)
    enc_out = out_flat.reshape(B, L, D_MODEL)
    attn = attn_flat.reshape(grid_n, N_HEAD, Bblk, L, L)
    attn = jnp.transpose(attn, (0, 2, 1, 3, 4)).reshape(B, N_HEAD, L, L)
    # event_update=False -> event_emb is returned unchanged; attn stays bf16
    # (halved HBM write from the kernel; cast downstream if f32 is required).
    return enc_out, attn, event_emb


def init_params(key):
    ks = jax.random.split(key, 8)

    def xavier(k, shape):
        fan_in, fan_out = shape
        limit = jnp.sqrt(6.0 / (fan_in + fan_out))
        return jax.random.uniform(k, shape, jnp.float32, -limit, limit)

    params = {
        "wq": xavier(ks[0], (D_MODEL, N_HEAD * D_K)),
        "bq": jnp.zeros((1, N_HEAD * D_K), jnp.float32),
        "wk": xavier(ks[1], (D_MODEL, N_HEAD * D_K)),
        "bk": jnp.zeros((1, N_HEAD * D_K), jnp.float32),
        "wv": xavier(ks[2], (D_MODEL, N_HEAD * D_V)),
        "bv": jnp.zeros((1, N_HEAD * D_V), jnp.float32),
        "wo": xavier(ks[3], (N_HEAD * D_V, D_MODEL)),     # O_h (xavier_uniform)
        "bo": jnp.zeros((1, D_MODEL), jnp.float32),
        "g1": jnp.ones((1, D_MODEL), jnp.float32),        # ln_1
        "be1": jnp.zeros((1, D_MODEL), jnp.float32),
        "g2": jnp.ones((1, D_MODEL), jnp.float32),        # ln_2
        "be2": jnp.zeros((1, D_MODEL), jnp.float32),
        "w1": xavier(ks[4], (D_MODEL, D_INNER)),          # pos_ffn.w_1
        "b1": jnp.zeros((1, D_INNER), jnp.float32),
        "w2": xavier(ks[5], (D_INNER, D_MODEL)),          # pos_ffn.w_2
        "b2": jnp.zeros((1, D_MODEL), jnp.float32),
    }
    return params


if __name__ == "__main__":
    B, L = 2, 8
    key = jax.random.PRNGKey(0)
    k0, k1, k2, k3 = jax.random.split(key, 4)

    enc_input = jax.random.normal(k0, (B, L, D_MODEL), jnp.float32)
    event_emb = jax.random.normal(k1, (B, L, D_MODEL), jnp.float32)
    enc_time = jnp.abs(jax.random.normal(k2, (B, L, 1), jnp.float32))

    # Last position of every sequence is padding.
    non_pad_mask = jnp.ones((B, L, 1), jnp.float32).at[:, -1, :].set(0.0)
    key_pad = (non_pad_mask[:, :, 0] == 0.0)                         # (B, L)
    slf_attn_mask = jnp.broadcast_to(key_pad[:, None, :], (B, L, L)).astype(jnp.float32)

    params = init_params(k3)

    enc_out, attn, ev_out = encoder_layer(
        enc_input, event_emb, enc_time, non_pad_mask, slf_attn_mask, params
    )
    jax.block_until_ready((enc_out, attn, ev_out))
    assert enc_out.shape == (B, L, D_MODEL)
    assert attn.shape == (B, N_HEAD, L, L)
    assert ev_out.shape == (B, L, D_MODEL)
    print("KERNEL_OK")
</pallas_src>

<mosaic_0001>
module attributes {stable_mosaic.version = 11 : i64} {
  func.func @encoder_layer_kernel(%arg0: i32, %arg1: memref<1x8x32xf32, #tpu.memory_space<vmem>>, %arg2: memref<1x8x32xbf16, #tpu.memory_space<vmem>>, %arg3: memref<1x8x1xf32, #tpu.memory_space<vmem>>, %arg4: memref<1x8x8xbf16, #tpu.memory_space<vmem>>, %arg5: memref<1x8x1xf32, #tpu.memory_space<vmem>>, %arg6: memref<32x64xbf16, #tpu.memory_space<vmem>>, %arg7: memref<32x32xbf16, #tpu.memory_space<vmem>>, %arg8: memref<32x32xbf16, #tpu.memory_space<vmem>>, %arg9: memref<32x64xbf16, #tpu.memory_space<vmem>>, %arg10: memref<64x32xbf16, #tpu.memory_space<vmem>>, %arg11: memref<16x128xf32, #tpu.memory_space<vmem>>, %arg12: memref<1x2x128xf32, #tpu.memory_space<vmem>>, %arg13: memref<1x1x128xbf16, #tpu.memory_space<vmem>>) attributes {dimension_semantics = [#tpu.dimension_semantics<parallel>], iteration_bounds = array<i64: 2>, scalar_prefetch = 0 : i64, scratch_operands = 0 : i64, tpu.core_type = #tpu.core_type<tc>, window_params = [{transform_indices = @transform_0, window_bounds = array<i64: 1, 8, 32>}, {transform_indices = @transform_1, window_bounds = array<i64: 1, 8, 32>}, {transform_indices = @transform_2, window_bounds = array<i64: 1, 8, 1>}, {transform_indices = @transform_3, window_bounds = array<i64: 1, 8, 8>}, {transform_indices = @transform_4, window_bounds = array<i64: 1, 8, 1>}, {pipeline_mode = #tpu.pipeline_mode<synchronous>, transform_indices = @transform_5, window_bounds = array<i64: 32, 64>}, {pipeline_mode = #tpu.pipeline_mode<synchronous>, transform_indices = @transform_6, window_bounds = array<i64: 32, 32>}, {pipeline_mode = #tpu.pipeline_mode<synchronous>, transform_indices = @transform_7, window_bounds = array<i64: 32, 32>}, {pipeline_mode = #tpu.pipeline_mode<synchronous>, transform_indices = @transform_8, window_bounds = array<i64: 32, 64>}, {pipeline_mode = #tpu.pipeline_mode<synchronous>, transform_indices = @transform_9, window_bounds = array<i64: 64, 32>}, {pipeline_mode = #tpu.pipeline_mode<synchronous>, transform_indices = @transform_10, window_bounds = array<i64: 16, 128>}, {transform_indices = @transform_11, window_bounds = array<i64: 1, 2, 128>}, {transform_indices = @transform_12, window_bounds = array<i64: 1, 1, 128>}]} {
    %c0 = arith.constant 0 : index
    %c0_0 = arith.constant 0 : index
    %c0_1 = arith.constant 0 : index
    %0 = vector.load %arg1[%c0, %c0_0, %c0_1] : memref<1x8x32xf32, #tpu.memory_space<vmem>>, vector<1x8x32xf32>
    %1 = vector.shape_cast %0 : vector<1x8x32xf32> to vector<8x32xf32>
    %c0_2 = arith.constant 0 : index
    %c0_3 = arith.constant 0 : index
    %c0_4 = arith.constant 0 : index
    %2 = vector.load %arg2[%c0_2, %c0_3, %c0_4] : memref<1x8x32xbf16, #tpu.memory_space<vmem>>, vector<1x8x32xbf16>
    %3 = vector.shape_cast %2 : vector<1x8x32xbf16> to vector<8x32xbf16>
    %c0_5 = arith.constant 0 : index
    %c0_6 = arith.constant 0 : index
    %c0_7 = arith.constant 0 : index
    %4 = vector.load %arg3[%c0_5, %c0_6, %c0_7] : memref<1x8x1xf32, #tpu.memory_space<vmem>>, vector<1x8x1xf32>
    %c0_8 = arith.constant 0 : index
    %c0_9 = arith.constant 0 : index
    %c0_10 = arith.constant 0 : index
    %5 = vector.load %arg5[%c0_8, %c0_9, %c0_10] : memref<1x8x1xf32, #tpu.memory_space<vmem>>, vector<1x8x1xf32>
    %6 = vector.shape_cast %5 : vector<1x8x1xf32> to vector<8x1xf32>
    %c0_11 = arith.constant 0 : index
    %c0_12 = arith.constant 0 : index
    %7 = vector.load %arg11[%c0_11, %c0_12] : memref<16x128xf32, #tpu.memory_space<vmem>>, vector<16x128xf32>
    %8 = vector.extract_strided_slice %7 {offsets = [0, 0], sizes = [1, 64], strides = [1, 1]} : vector<16x128xf32> to vector<1x64xf32>
    %9 = vector.extract_strided_slice %7 {offsets = [1, 0], sizes = [1, 32], strides = [1, 1]} : vector<16x128xf32> to vector<1x32xf32>
    %10 = vector.extract_strided_slice %7 {offsets = [2, 0], sizes = [1, 32], strides = [1, 1]} : vector<16x128xf32> to vector<1x32xf32>
    %11 = vector.extract_strided_slice %7 {offsets = [3, 0], sizes = [1, 32], strides = [1, 1]} : vector<16x128xf32> to vector<1x32xf32>
    %12 = vector.extract_strided_slice %7 {offsets = [4, 0], sizes = [1, 32], strides = [1, 1]} : vector<16x128xf32> to vector<1x32xf32>
    %13 = vector.extract_strided_slice %7 {offsets = [5, 0], sizes = [1, 32], strides = [1, 1]} : vector<16x128xf32> to vector<1x32xf32>
    %14 = vector.extract_strided_slice %7 {offsets = [6, 0], sizes = [1, 32], strides = [1, 1]} : vector<16x128xf32> to vector<1x32xf32>
    %15 = vector.extract_strided_slice %7 {offsets = [7, 0], sizes = [1, 64], strides = [1, 1]} : vector<16x128xf32> to vector<1x64xf32>
    %16 = vector.extract_strided_slice %7 {offsets = [8, 0], sizes = [1, 32], strides = [1, 1]} : vector<16x128xf32> to vector<1x32xf32>
    %cst = arith.constant dense<0.000000e+00> : vector<8xf32>
    %17 = vector.multi_reduction <add>, %1, %cst [1] : vector<8x32xf32> to vector<8xf32>
    %18 = vector.shape_cast %17 : vector<8xf32> to vector<8x1xf32>
    %cst_13 = arith.constant 3.200000e+01 : f32
    %19 = vector.broadcast %cst_13 : f32 to vector<8x1xf32>
    %20 = arith.divf %18, %19 : vector<8x1xf32>
    %21 = vector.broadcast %20 : vector<8x1xf32> to vector<8x32xf32>
    %22 = arith.subf %1, %21 : vector<8x32xf32>
    %23 = arith.mulf %22, %22 : vector<8x32xf32>
    %cst_14 = arith.constant dense<0.000000e+00> : vector<8xf32>
    %24 = vector.multi_reduction <add>, %23, %cst_14 [1] : vector<8x32xf32> to vector<8xf32>
    %25 = vector.shape_cast %24 : vector<8xf32> to vector<8x1xf32>
    %cst_15 = arith.constant 3.200000e+01 : f32
    %26 = vector.broadcast %cst_15 : f32 to vector<8x1xf32>
    %27 = arith.divf %25, %26 : vector<8x1xf32>
    %28 = vector.broadcast %20 : vector<8x1xf32> to vector<8x32xf32>
    %29 = arith.subf %1, %28 : vector<8x32xf32>
    %cst_16 = arith.constant 9.99999974E-6 : f32
    %30 = vector.broadcast %cst_16 : f32 to vector<8x1xf32>
    %31 = arith.addf %27, %30 : vector<8x1xf32>
    %32 = math.rsqrt %31 : vector<8x1xf32>
    %33 = vector.broadcast %32 : vector<8x1xf32> to vector<8x32xf32>
    %34 = arith.mulf %29, %33 : vector<8x32xf32>
    %35 = vector.broadcast %11 : vector<1x32xf32> to vector<8x32xf32>
    %36 = arith.mulf %34, %35 : vector<8x32xf32>
    %37 = vector.broadcast %12 : vector<1x32xf32> to vector<8x32xf32>
    %38 = arith.addf %36, %37 : vector<8x32xf32>
    %39 = arith.truncf %38 : vector<8x32xf32> to vector<8x32xbf16>
    %c0_17 = arith.constant 0 : index
    %c0_18 = arith.constant 0 : index
    %40 = vector.load %arg6[%c0_17, %c0_18] : memref<32x64xbf16, #tpu.memory_space<vmem>>, vector<32x64xbf16>
    %cst_19 = arith.constant dense<0.000000e+00> : vector<8x64xf32>
    %41 = tpu.matmul %3, %40, %cst_19 {dimension_numbers = #tpu.dot_dimension_numbers<[1], [0], [0], [1], [0, 0, 1, 1], [], []>} : vector<8x32xbf16>, vector<32x64xbf16>, vector<8x64xf32> -> vector<8x64xf32>
    %42 = vector.broadcast %8 : vector<1x64xf32> to vector<8x64xf32>
    %43 = arith.addf %41, %42 : vector<8x64xf32>
    %c0_20 = arith.constant 0 : index
    %c0_21 = arith.constant 0 : index
    %44 = vector.load %arg7[%c0_20, %c0_21] : memref<32x32xbf16, #tpu.memory_space<vmem>>, vector<32x32xbf16>
    %cst_22 = arith.constant dense<0.000000e+00> : vector<8x32xf32>
    %45 = tpu.matmul %39, %44, %cst_22 {dimension_numbers = #tpu.dot_dimension_numbers<[1], [0], [0], [1], [0, 0, 1, 1], [], []>} : vector<8x32xbf16>, vector<32x32xbf16>, vector<8x32xf32> -> vector<8x32xf32>
    %46 = vector.broadcast %9 : vector<1x32xf32> to vector<8x32xf32>
    %47 = arith.addf %45, %46 : vector<8x32xf32>
    %48 = vector.extract_strided_slice %43 {offsets = [0, 0], sizes = [8, 16], strides = [1, 1]} : vector<8x64xf32> to vector<8x16xf32>
    %49 = vector.shape_cast %48 : vector<8x16xf32> to vector<1x8x16xf32>
    %50 = vector.extract_strided_slice %43 {offsets = [0, 16], sizes = [8, 16], strides = [1, 1]} : vector<8x64xf32> to vector<8x16xf32>
    %51 = vector.shape_cast %50 : vector<8x16xf32> to vector<1x8x16xf32>
    %52 = tpu.concatenate %49, %51 in 0 : vector<1x8x16xf32>, vector<1x8x16xf32> -> vector<2x8x16xf32>
    %53 = vector.extract_strided_slice %43 {offsets = [0, 32], sizes = [8, 16], strides = [1, 1]} : vector<8x64xf32> to vector<8x16xf32>
    %54 = vector.shape_cast %53 : vector<8x16xf32> to vector<1x8x16xf32>
    %55 = vector.extract_strided_slice %43 {offsets = [0, 48], sizes = [8, 16], strides = [1, 1]} : vector<8x64xf32> to vector<8x16xf32>
    %56 = vector.shape_cast %55 : vector<8x16xf32> to vector<1x8x16xf32>
    %57 = tpu.concatenate %54, %56 in 0 : vector<1x8x16xf32>, vector<1x8x16xf32> -> vector<2x8x16xf32>
    %58 = vector.extract_strided_slice %47 {offsets = [0, 0], sizes = [8, 16], strides = [1, 1]} : vector<8x32xf32> to vector<8x16xf32>
    %59 = vector.shape_cast %58 : vector<8x16xf32> to vector<1x8x16xf32>
    %60 = vector.extract_strided_slice %47 {offsets = [0, 16], sizes = [8, 16], strides = [1, 1]} : vector<8x32xf32> to vector<8x16xf32>
    %61 = vector.shape_cast %60 : vector<8x16xf32> to vector<1x8x16xf32>
    %62 = tpu.concatenate %59, %61 in 0 : vector<1x8x16xf32>, vector<1x8x16xf32> -> vector<2x8x16xf32>
    %c0_23 = arith.constant 0 : index
    %c0_24 = arith.constant 0 : index
    %c0_25 = arith.constant 0 : index
    %63 = vector.load %arg4[%c0_23, %c0_24, %c0_25] : memref<1x8x8xbf16, #tpu.memory_space<vmem>>, vector<1x8x8xbf16>
    %64 = tpu.concatenate %63, %63 in 0 : vector<1x8x8xbf16>, vector<1x8x8xbf16> -> vector<2x8x8xbf16>
    %65 = tpu.concatenate %4, %4 in 0 : vector<1x8x1xf32>, vector<1x8x1xf32> -> vector<2x8x1xf32>
    %66 = arith.truncf %52 : vector<2x8x16xf32> to vector<2x8x16xbf16>
    %67 = arith.truncf %57 : vector<2x8x16xf32> to vector<2x8x16xbf16>
    "tpu.trace_start"() <{level = 10 : i32, message = "bld,bmd->blm"}> : () -> ()
    %cst_26 = arith.constant dense<0.000000e+00> : vector<2x8x8xf32>
    %68 = tpu.matmul %66, %67, %cst_26 {dimension_numbers = #tpu.dot_dimension_numbers<[2], [2], [1], [1], [0, 0, 0, 1, 1, 1], [0], [0]>} : vector<2x8x16xbf16>, vector<2x8x16xbf16>, vector<2x8x8xf32> -> vector<2x8x8xf32>
    "tpu.trace_stop"() : () -> ()
    %cst_27 = arith.constant 2.500000e-01 : f32
    %69 = vector.broadcast %cst_27 : f32 to vector<2x8x8xf32>
    %70 = arith.mulf %68, %69 : vector<2x8x8xf32>
    %cst_28 = arith.constant 5.000000e-01 : bf16
    %71 = vector.broadcast %cst_28 : bf16 to vector<2x8x8xbf16>
    %72 = arith.cmpf ogt, %64, %71 : vector<2x8x8xbf16>
    %cst_29 = arith.constant -1.000000e+09 : f32
    %73 = vector.broadcast %cst_29 : f32 to vector<2x8x8xf32>
    %74 = arith.select %72, %73, %70 : vector<2x8x8xi1>, vector<2x8x8xf32>
    %cst_30 = arith.constant dense<0xFF800000> : vector<2x8xf32>
    %75 = vector.multi_reduction <maximumf>, %74, %cst_30 [2] : vector<2x8x8xf32> to vector<2x8xf32>
    %76 = vector.shape_cast %75 : vector<2x8xf32> to vector<2x8x1xf32>
    %77 = vector.broadcast %76 : vector<2x8x1xf32> to vector<2x8x8xf32>
    %78 = arith.subf %74, %77 : vector<2x8x8xf32>
    %79 = math.exp %78 : vector<2x8x8xf32>
    %cst_31 = arith.constant dense<0.000000e+00> : vector<2x8xf32>
    %80 = vector.multi_reduction <add>, %79, %cst_31 [2] : vector<2x8x8xf32> to vector<2x8xf32>
    %81 = vector.shape_cast %80 : vector<2x8xf32> to vector<2x8x1xf32>
    %82 = tpu.reciprocal %81 {approx = true} : vector<2x8x1xf32> -> vector<2x8x1xf32>
    %83 = vector.broadcast %82 : vector<2x8x1xf32> to vector<2x8x8xf32>
    %84 = arith.mulf %79, %83 : vector<2x8x8xf32>
    %85 = arith.truncf %84 : vector<2x8x8xf32> to vector<2x8x8xbf16>
    %86 = vector.shape_cast %85 : vector<2x8x8xbf16> to vector<16x8xbf16>
    %87 = vector.shape_cast %86 : vector<16x8xbf16> to vector<1x16x8xbf16>
    %88 = vector.extract_strided_slice %87 {offsets = [0, 0, 0], sizes = [1, 1, 8], strides = [1, 1, 1]} : vector<1x16x8xbf16> to vector<1x1x8xbf16>
    %89 = vector.shape_cast %88 : vector<1x1x8xbf16> to vector<1x8xbf16>
    %90 = vector.extract_strided_slice %87 {offsets = [0, 1, 0], sizes = [1, 1, 8], strides = [1, 1, 1]} : vector<1x16x8xbf16> to vector<1x1x8xbf16>
    %91 = vector.shape_cast %90 : vector<1x1x8xbf16> to vector<1x8xbf16>
    %92 = vector.extract_strided_slice %87 {offsets = [0, 2, 0], sizes = [1, 1, 8], strides = [1, 1, 1]} : vector<1x16x8xbf16> to vector<1x1x8xbf16>
    %93 = vector.shape_cast %92 : vector<1x1x8xbf16> to vector<1x8xbf16>
    %94 = vector.extract_strided_slice %87 {offsets = [0, 3, 0], sizes = [1, 1, 8], strides = [1, 1, 1]} : vector<1x16x8xbf16> to vector<1x1x8xbf16>
    %95 = vector.shape_cast %94 : vector<1x1x8xbf16> to vector<1x8xbf16>
    %96 = vector.extract_strided_slice %87 {offsets = [0, 4, 0], sizes = [1, 1, 8], strides = [1, 1, 1]} : vector<1x16x8xbf16> to vector<1x1x8xbf16>
    %97 = vector.shape_cast %96 : vector<1x1x8xbf16> to vector<1x8xbf16>
    %98 = vector.extract_strided_slice %87 {offsets = [0, 5, 0], sizes = [1, 1, 8], strides = [1, 1, 1]} : vector<1x16x8xbf16> to vector<1x1x8xbf16>
    %99 = vector.shape_cast %98 : vector<1x1x8xbf16> to vector<1x8xbf16>
    %100 = vector.extract_strided_slice %87 {offsets = [0, 6, 0], sizes = [1, 1, 8], strides = [1, 1, 1]} : vector<1x16x8xbf16> to vector<1x1x8xbf16>
    %101 = vector.shape_cast %100 : vector<1x1x8xbf16> to vector<1x8xbf16>
    %102 = vector.extract_strided_slice %87 {offsets = [0, 7, 0], sizes = [1, 1, 8], strides = [1, 1, 1]} : vector<1x16x8xbf16> to vector<1x1x8xbf16>
    %103 = vector.shape_cast %102 : vector<1x1x8xbf16> to vector<1x8xbf16>
    %104 = vector.extract_strided_slice %87 {offsets = [0, 8, 0], sizes = [1, 1, 8], strides = [1, 1, 1]} : vector<1x16x8xbf16> to vector<1x1x8xbf16>
    %105 = vector.shape_cast %104 : vector<1x1x8xbf16> to vector<1x8xbf16>
    %106 = vector.extract_strided_slice %87 {offsets = [0, 9, 0], sizes = [1, 1, 8], strides = [1, 1, 1]} : vector<1x16x8xbf16> to vector<1x1x8xbf16>
    %107 = vector.shape_cast %106 : vector<1x1x8xbf16> to vector<1x8xbf16>
    %108 = vector.extract_strided_slice %87 {offsets = [0, 10, 0], sizes = [1, 1, 8], strides = [1, 1, 1]} : vector<1x16x8xbf16> to vector<1x1x8xbf16>
    %109 = vector.shape_cast %108 : vector<1x1x8xbf16> to vector<1x8xbf16>
    %110 = vector.extract_strided_slice %87 {offsets = [0, 11, 0], sizes = [1, 1, 8], strides = [1, 1, 1]} : vector<1x16x8xbf16> to vector<1x1x8xbf16>
    %111 = vector.shape_cast %110 : vector<1x1x8xbf16> to vector<1x8xbf16>
    %112 = vector.extract_strided_slice %87 {offsets = [0, 12, 0], sizes = [1, 1, 8], strides = [1, 1, 1]} : vector<1x16x8xbf16> to vector<1x1x8xbf16>
    %113 = vector.shape_cast %112 : vector<1x1x8xbf16> to vector<1x8xbf16>
    %114 = vector.extract_strided_slice %87 {offsets = [0, 13, 0], sizes = [1, 1, 8], strides = [1, 1, 1]} : vector<1x16x8xbf16> to vector<1x1x8xbf16>
    %115 = vector.shape_cast %114 : vector<1x1x8xbf16> to vector<1x8xbf16>
    %116 = vector.extract_strided_slice %87 {offsets = [0, 14, 0], sizes = [1, 1, 8], strides = [1, 1, 1]} : vector<1x16x8xbf16> to vector<1x1x8xbf16>
    %117 = vector.shape_cast %116 : vector<1x1x8xbf16> to vector<1x8xbf16>
    %118 = vector.extract_strided_slice %87 {offsets = [0, 15, 0], sizes = [1, 1, 8], strides = [1, 1, 1]} : vector<1x16x8xbf16> to vector<1x1x8xbf16>
    %119 = vector.shape_cast %118 : vector<1x1x8xbf16> to vector<1x8xbf16>
    %120 = tpu.concatenate %89, %91, %93, %95, %97, %99, %101, %103, %105, %107, %109, %111, %113, %115, %117, %119 in 1 : vector<1x8xbf16>, vector<1x8xbf16>, vector<1x8xbf16>, vector<1x8xbf16>, vector<1x8xbf16>, vector<1x8xbf16>, vector<1x8xbf16>, vector<1x8xbf16>, vector<1x8xbf16>, vector<1x8xbf16>, vector<1x8xbf16>, vector<1x8xbf16>, vector<1x8xbf16>, vector<1x8xbf16>, vector<1x8xbf16>, vector<1x8xbf16> -> vector<1x128xbf16>
    %121 = vector.shape_cast %120 : vector<1x128xbf16> to vector<1x1x128xbf16>
    %c0_32 = arith.constant 0 : index
    %c0_33 = arith.constant 0 : index
    %c0_34 = arith.constant 0 : index
    %122 = vector.load %arg13[%c0_32, %c0_33, %c0_34] : memref<1x1x128xbf16, #tpu.memory_space<vmem>>, vector<1x1x128xbf16>
    tpu.vector_store %arg13[%c0_32, %c0_33, %c0_34], %121 {strides = array<i32>} : memref<1x1x128xbf16, #tpu.memory_space<vmem>>, vector<1x1x128xbf16>,
    %123 = arith.truncf %62 : vector<2x8x16xf32> to vector<2x8x16xbf16>
    "tpu.trace_start"() <{level = 10 : i32, message = "blm,bmd->bld"}> : () -> ()
    %cst_35 = arith.constant dense<0.000000e+00> : vector<2x8x16xf32>
    %124 = tpu.matmul %85, %123, %cst_35 {dimension_numbers = #tpu.dot_dimension_numbers<[2], [1], [1], [2], [0, 0, 0, 1, 1, 2], [0], [0]>} : vector<2x8x8xbf16>, vector<2x8x16xbf16>, vector<2x8x16xf32> -> vector<2x8x16xf32>
    "tpu.trace_stop"() : () -> ()
    %125 = arith.subf %124, %62 : vector<2x8x16xf32>
    %cst_36 = arith.constant 1.000000e+00 : f32
    %126 = vector.broadcast %cst_36 : f32 to vector<2x8x1xf32>
    %127 = arith.mulf %65, %126 : vector<2x8x1xf32>
    %128 = vector.broadcast %127 : vector<2x8x1xf32> to vector<2x8x16xf32>
    %129 = arith.mulf %128, %125 : vector<2x8x16xf32>
    %130 = arith.addf %62, %129 : vector<2x8x16xf32>
    %131 = arith.mulf %65, %65 : vector<2x8x1xf32>
    %132 = arith.truncf %125 : vector<2x8x16xf32> to vector<2x8x16xbf16>
    "tpu.trace_start"() <{level = 10 : i32, message = "blm,bmd->bld"}> : () -> ()
    %cst_37 = arith.constant dense<0.000000e+00> : vector<2x8x16xf32>
    %133 = tpu.matmul %85, %132, %cst_37 {dimension_numbers = #tpu.dot_dimension_numbers<[2], [1], [1], [2], [0, 0, 0, 1, 1, 2], [0], [0]>} : vector<2x8x8xbf16>, vector<2x8x16xbf16>, vector<2x8x16xf32> -> vector<2x8x16xf32>
    "tpu.trace_stop"() : () -> ()
    %134 = arith.subf %133, %125 : vector<2x8x16xf32>
    %cst_38 = arith.constant 5.000000e-01 : f32
    %135 = vector.broadcast %cst_38 : f32 to vector<2x8x1xf32>
    %136 = arith.mulf %131, %135 : vector<2x8x1xf32>
    %137 = vector.broadcast %136 : vector<2x8x1xf32> to vector<2x8x16xf32>
    %138 = arith.mulf %137, %134 : vector<2x8x16xf32>
    %139 = arith.addf %130, %138 : vector<2x8x16xf32>
    %140 = vector.extract_strided_slice %139 {offsets = [0, 0, 0], sizes = [1, 8, 16], strides = [1, 1, 1]} : vector<2x8x16xf32> to vector<1x8x16xf32>
    %141 = vector.shape_cast %140 : vector<1x8x16xf32> to vector<8x16xf32>
    %142 = vector.extract_strided_slice %139 {offsets = [1, 0, 0], sizes = [1, 8, 16], strides = [1, 1, 1]} : vector<2x8x16xf32> to vector<1x8x16xf32>
    %143 = vector.shape_cast %142 : vector<1x8x16xf32> to vector<8x16xf32>
    %144 = tpu.concatenate %141, %143 in 1 : vector<8x16xf32>, vector<8x16xf32> -> vector<8x32xf32>
    %145 = vector.broadcast %10 : vector<1x32xf32> to vector<8x32xf32>
    %146 = arith.addf %38, %145 : vector<8x32xf32>
    %147 = arith.truncf %144 : vector<8x32xf32> to vector<8x32xbf16>
    %c0_39 = arith.constant 0 : index
    %c0_40 = arith.constant 0 : index
    %148 = vector.load %arg8[%c0_39, %c0_40] : memref<32x32xbf16, #tpu.memory_space<vmem>>, vector<32x32xbf16>
    %cst_41 = arith.constant dense<0.000000e+00> : vector<8x32xf32>
    %149 = tpu.matmul %147, %148, %cst_41 {dimension_numbers = #tpu.dot_dimension_numbers<[1], [0], [0], [1], [0, 0, 1, 1], [], []>} : vector<8x32xbf16>, vector<32x32xbf16>, vector<8x32xf32> -> vector<8x32xf32>
    %150 = arith.addf %146, %149 : vector<8x32xf32>
    %151 = vector.broadcast %6 : vector<8x1xf32> to vector<8x32xf32>
    %152 = arith.mulf %150, %151 : vector<8x32xf32>
    %cst_42 = arith.constant dense<0.000000e+00> : vector<8xf32>
    %153 = vector.multi_reduction <add>, %152, %cst_42 [1] : vector<8x32xf32> to vector<8xf32>
    %154 = vector.shape_cast %153 : vector<8xf32> to vector<8x1xf32>
    %cst_43 = arith.constant 3.200000e+01 : f32
    %155 = vector.broadcast %cst_43 : f32 to vector<8x1xf32>
    %156 = arith.divf %154, %155 : vector<8x1xf32>
    %157 = vector.broadcast %156 : vector<8x1xf32> to vector<8x32xf32>
    %158 = arith.subf %152, %157 : vector<8x32xf32>
    %159 = arith.mulf %158, %158 : vector<8x32xf32>
    %cst_44 = arith.constant dense<0.000000e+00> : vector<8xf32>
    %160 = vector.multi_reduction <add>, %159, %cst_44 [1] : vector<8x32xf32> to vector<8xf32>
    %161 = vector.shape_cast %160 : vector<8xf32> to vector<8x1xf32>
    %cst_45 = arith.constant 3.200000e+01 : f32
    %162 = vector.broadcast %cst_45 : f32 to vector<8x1xf32>
    %163 = arith.divf %161, %162 : vector<8x1xf32>
    %164 = vector.broadcast %156 : vector<8x1xf32> to vector<8x32xf32>
    %165 = arith.subf %152, %164 : vector<8x32xf32>
    %cst_46 = arith.constant 9.99999974E-6 : f32
    %166 = vector.broadcast %cst_46 : f32 to vector<8x1xf32>
    %167 = arith.addf %163, %166 : vector<8x1xf32>
    %168 = math.rsqrt %167 : vector<8x1xf32>
    %169 = vector.broadcast %168 : vector<8x1xf32> to vector<8x32xf32>
    %170 = arith.mulf %165, %169 : vector<8x32xf32>
    %171 = vector.broadcast %13 : vector<1x32xf32> to vector<8x32xf32>
    %172 = arith.mulf %170, %171 : vector<8x32xf32>
    %173 = vector.broadcast %14 : vector<1x32xf32> to vector<8x32xf32>
    %174 = arith.addf %172, %173 : vector<8x32xf32>
    %175 = arith.truncf %174 : vector<8x32xf32> to vector<8x32xbf16>
    %c0_47 = arith.constant 0 : index
    %c0_48 = arith.constant 0 : index
    %176 = vector.load %arg9[%c0_47, %c0_48] : memref<32x64xbf16, #tpu.memory_space<vmem>>, vector<32x64xbf16>
    %cst_49 = arith.constant dense<0.000000e+00> : vector<8x64xf32>
    %177 = tpu.matmul %175, %176, %cst_49 {dimension_numbers = #tpu.dot_dimension_numbers<[1], [0], [0], [1], [0, 0, 1, 1], [], []>} : vector<8x32xbf16>, vector<32x64xbf16>, vector<8x64xf32> -> vector<8x64xf32>
    %178 = vector.broadcast %15 : vector<1x64xf32> to vector<8x64xf32>
    %179 = arith.addf %177, %178 : vector<8x64xf32>
    %180 = arith.mulf %179, %179 : vector<8x64xf32>
    %181 = arith.mulf %179, %180 : vector<8x64xf32>
    %cst_50 = arith.constant 4.471500e-02 : f32
    %182 = vector.broadcast %cst_50 : f32 to vector<8x64xf32>
    %183 = arith.mulf %182, %181 : vector<8x64xf32>
    %184 = arith.addf %179, %183 : vector<8x64xf32>
    %cst_51 = arith.constant 0.797884583 : f32
    %185 = vector.broadcast %cst_51 : f32 to vector<8x64xf32>
    %186 = arith.mulf %185, %184 : vector<8x64xf32>
    %187 = math.tanh %186 : vector<8x64xf32>
    %cst_52 = arith.constant 1.000000e+00 : f32
    %188 = vector.broadcast %cst_52 : f32 to vector<8x64xf32>
    %189 = arith.addf %188, %187 : vector<8x64xf32>
    %cst_53 = arith.constant 5.000000e-01 : f32
    %190 = vector.broadcast %cst_53 : f32 to vector<8x64xf32>
    %191 = arith.mulf %190, %189 : vector<8x64xf32>
    %192 = arith.mulf %179, %191 : vector<8x64xf32>
    %193 = arith.truncf %192 : vector<8x64xf32> to vector<8x64xbf16>
    %c0_54 = arith.constant 0 : index
    %c0_55 = arith.constant 0 : index
    %194 = vector.load %arg10[%c0_54, %c0_55] : memref<64x32xbf16, #tpu.memory_space<vmem>>, vector<64x32xbf16>
    %cst_56 = arith.constant dense<0.000000e+00> : vector<8x32xf32>
    %195 = tpu.matmul %193, %194, %cst_56 {dimension_numbers = #tpu.dot_dimension_numbers<[1], [0], [0], [1], [0, 0, 1, 1], [], []>} : vector<8x64xbf16>, vector<64x32xbf16>, vector<8x32xf32> -> vector<8x32xf32>
    %196 = vector.broadcast %16 : vector<1x32xf32> to vector<8x32xf32>
    %197 = arith.addf %195, %196 : vector<8x32xf32>
    %198 = arith.addf %197, %152 : vector<8x32xf32>
    %199 = vector.broadcast %6 : vector<8x1xf32> to vector<8x32xf32>
    %200 = arith.mulf %198, %199 : vector<8x32xf32>
    %201 = vector.shape_cast %200 : vector<8x32xf32> to vector<2x4x32xf32>
    %202 = vector.extract_strided_slice %201 {offsets = [0, 0, 0], sizes = [2, 1, 32], strides = [1, 1, 1]} : vector<2x4x32xf32> to vector<2x1x32xf32>
    %203 = vector.shape_cast %202 : vector<2x1x32xf32> to vector<2x32xf32>
    %204 = vector.extract_strided_slice %201 {offsets = [0, 1, 0], sizes = [2, 1, 32], strides = [1, 1, 1]} : vector<2x4x32xf32> to vector<2x1x32xf32>
    %205 = vector.shape_cast %204 : vector<2x1x32xf32> to vector<2x32xf32>
    %206 = vector.extract_strided_slice %201 {offsets = [0, 2, 0], sizes = [2, 1, 32], strides = [1, 1, 1]} : vector<2x4x32xf32> to vector<2x1x32xf32>
    %207 = vector.shape_cast %206 : vector<2x1x32xf32> to vector<2x32xf32>
    %208 = vector.extract_strided_slice %201 {offsets = [0, 3, 0], sizes = [2, 1, 32], strides = [1, 1, 1]} : vector<2x4x32xf32> to vector<2x1x32xf32>
    %209 = vector.shape_cast %208 : vector<2x1x32xf32> to vector<2x32xf32>
    %210 = tpu.concatenate %203, %205, %207, %209 in 1 : vector<2x32xf32>, vector<2x32xf32>, vector<2x32xf32>, vector<2x32xf32> -> vector<2x128xf32>
    %211 = vector.shape_cast %210 : vector<2x128xf32> to vector<1x2x128xf32>
    %c0_57 = arith.constant 0 : index
    %c0_58 = arith.constant 0 : index
    %c0_59 = arith.constant 0 : index
    %212 = vector.load %arg12[%c0_57, %c0_58, %c0_59] : memref<1x2x128xf32, #tpu.memory_space<vmem>>, vector<1x2x128xf32>
    tpu.vector_store %arg12[%c0_57, %c0_58, %c0_59], %211 {strides = array<i32>} : memref<1x2x128xf32, #tpu.memory_space<vmem>>, vector<1x2x128xf32>,
    return
  }
  func.func @transform_0(%arg0: i32) -> (i32, i32, i32) {
    %c0_i32 = arith.constant 0 : i32
    %c0_i32_0 = arith.constant 0 : i32
    %c0_i32_1 = arith.constant 0 : i32
    return %arg0, %c0_i32, %c0_i32_0 : i32, i32, i32
  }
  func.func @transform_1(%arg0: i32) -> (i32, i32, i32) {
    %c0_i32 = arith.constant 0 : i32
    %c0_i32_0 = arith.constant 0 : i32
    %c0_i32_1 = arith.constant 0 : i32
    return %arg0, %c0_i32, %c0_i32_0 : i32, i32, i32
  }
  func.func @transform_2(%arg0: i32) -> (i32, i32, i32) {
    %c0_i32 = arith.constant 0 : i32
    %c0_i32_0 = arith.constant 0 : i32
    %c0_i32_1 = arith.constant 0 : i32
    return %arg0, %c0_i32, %c0_i32_0 : i32, i32, i32
  }
  func.func @transform_3(%arg0: i32) -> (i32, i32, i32) {
    %c0_i32 = arith.constant 0 : i32
    %c0_i32_0 = arith.constant 0 : i32
    %c0_i32_1 = arith.constant 0 : i32
    return %arg0, %c0_i32, %c0_i32_0 : i32, i32, i32
  }
  func.func @transform_4(%arg0: i32) -> (i32, i32, i32) {
    %c0_i32 = arith.constant 0 : i32
    %c0_i32_0 = arith.constant 0 : i32
    %c0_i32_1 = arith.constant 0 : i32
    return %arg0, %c0_i32, %c0_i32_0 : i32, i32, i32
  }
  func.func @transform_5(%arg0: i32) -> (i32, i32) {
    %c0_i32 = arith.constant 0 : i32
    %c0_i32_0 = arith.constant 0 : i32
    %c0_i32_1 = arith.constant 0 : i32
    return %c0_i32, %c0_i32_0 : i32, i32
  }
  func.func @transform_6(%arg0: i32) -> (i32, i32) {
    %c0_i32 = arith.constant 0 : i32
    %c0_i32_0 = arith.constant 0 : i32
    %c0_i32_1 = arith.constant 0 : i32
    return %c0_i32, %c0_i32_0 : i32, i32
  }
  func.func @transform_7(%arg0: i32) -> (i32, i32) {
    %c0_i32 = arith.constant 0 : i32
    %c0_i32_0 = arith.constant 0 : i32
    %c0_i32_1 = arith.constant 0 : i32
    return %c0_i32, %c0_i32_0 : i32, i32
  }
  func.func @transform_8(%arg0: i32) -> (i32, i32) {
    %c0_i32 = arith.constant 0 : i32
    %c0_i32_0 = arith.constant 0 : i32
    %c0_i32_1 = arith.constant 0 : i32
    return %c0_i32, %c0_i32_0 : i32, i32
  }
  func.func @transform_9(%arg0: i32) -> (i32, i32) {
    %c0_i32 = arith.constant 0 : i32
    %c0_i32_0 = arith.constant 0 : i32
    %c0_i32_1 = arith.constant 0 : i32
    return %c0_i32, %c0_i32_0 : i32, i32
  }
  func.func @transform_10(%arg0: i32) -> (i32, i32) {
    %c0_i32 = arith.constant 0 : i32
    %c0_i32_0 = arith.constant 0 : i32
    %c0_i32_1 = arith.constant 0 : i32
    return %c0_i32, %c0_i32_0 : i32, i32
  }
  func.func @transform_11(%arg0: i32) -> (i32, i32, i32) {
    %c0_i32 = arith.constant 0 : i32
    %c0_i32_0 = arith.constant 0 : i32
    %c0_i32_1 = arith.constant 0 : i32
    return %arg0, %c0_i32, %c0_i32_0 : i32, i32, i32
  }
  func.func @transform_12(%arg0: i32) -> (i32, i32, i32) {
    %c0_i32 = arith.constant 0 : i32
    %c0_i32_0 = arith.constant 0 : i32
    %c0_i32_1 = arith.constant 0 : i32
    return %arg0, %c0_i32, %c0_i32_0 : i32, i32, i32
  }
}

</mosaic_0001>

<bundles_post_ra>
// kernel: tpu_custom_call.1
= control target key start
LH: loop header
LB: loop body
LE: loop exit
PB: predicated region body
PF: predicated region fallthrough
CT: control target
= control target key end

     0   :  { %s2570_s0 = inlined_call_operand.vmem [shape: f32[2,8,32], index: 0, kind: input, shape index: {}]   ;;  %s2571_s1 = inlined_call_operand.hbm [shape: bf16[2,8,32], index: 1, kind: input, shape index: {}]   ;;  %s2572_s2 = inlined_call_operand.vmem [shape: f32[2,8,1], index: 2, kind: input, shape index: {}]   ;;  %s2573_s3 = inlined_call_operand.hbm [shape: bf16[2,8,8], index: 3, kind: input, shape index: {}]   ;;  %s2574_s4 = inlined_call_operand.vmem [shape: f32[2,8,1], index: 4, kind: input, shape index: {}]   ;;  %s2575_s5 = inlined_call_operand.vmem [shape: bf16[32,64], index: 5, kind: input, shape index: {}]   ;;  %s2576_s6 = inlined_call_operand.vmem [shape: bf16[32,32], index: 6, kind: input, shape index: {}]   ;;  %s2577_s7 = inlined_call_operand.vmem [shape: bf16[32,32], index: 7, kind: input, shape index: {}]   ;;  %s2578_s8 = inlined_call_operand.vmem [shape: bf16[32,64], index: 8, kind: input, shape index: {}]   ;;  %s2579_s9 = inlined_call_operand.vmem [shape: bf16[64,32], index: 9, kind: input, shape index: {}]   ;;  %s2580_s10 = inlined_call_operand.hbm [shape: f32[16,128], index: 10, kind: input, shape index: {}]   ;;  %s2581_s11 = inlined_call_operand.hbm [shape: f32[2,2,128], index: 11, kind: output, shape index: {0}]   ;;  %s2582_s12 = inlined_call_operand.vmem [shape: bf16[2,1,128], index: 12, kind: output, shape index: {1}]  }
   0x1   :  { %2596 = sst [smem:[#allocation19_spill]] %s2579_s9 }
   0x2   :  { %2597 = sst [smem:[#allocation20_spill]] %s2580_s10 }
   0x3   :  { %2598 = sst [smem:[#allocation21_spill]] %s2581_s11 }
   0x4   :  { %18 = vsyncpa [#allocation3], 0 }
   0x5   :  { %20 = vsyncpa [#allocation3 + $0x1], 0 }
   0x6   :  { %21 = vsyncpa [#allocation6], 0 }
   0x7   :  { %23 = vsyncpa [#allocation6 + $0x1], 0 }
   0x8   :  { %24 = vsyncpa [#allocation4], 0 }
   0x9   :  { %26 = vsyncpa [#allocation4 + $0x1], 0  ;;  %s2141_s21 = smov 0   ;;  %s2143_s22 = smov 0  }
   0xa   :  { %s2145_s23 = smov 0   ;;  %s2147_s24 = smov 0  }
   0xb LB: > { %2599 = sst [smem:[#allocation13_spill]] %s2038_s21  ;;  %s2162_s25 = sadd.s32 4294967295, %s2050_s24   ;;  %s2050_s24 = sphi %s2147_s24, %s2625_s24   ;;  %s2046_s23 = sphi %s2145_s23, %s2627_s23   ;;  %s2042_s22 = sphi %s2143_s22, %s2629_s22   ;;  %s2038_s21 = sphi %s2141_s21, %s2628_s21  }
   0xc   : > { %2600 = sst [smem:[#allocation14_spill]] %s2046_s23  ;;  %s1634_s26 = sadd.s32 4294967294, %s2050_s24  }
   0xd   : > { %p78_p0 = scmp.ne.s32.totalorder %s2042_s22, %s2038_s21  ;;  %p2592_p1 = scmp.eq.s32.totalorder %s2162_s25, 0 }
   0xe   : > { %p312_p3 = scmp.eq.s32.totalorder %s1634_s26, 1  ;;  %p1635_p5 = scmp.ge.s32.totalorder %s2050_s24, 1 }
   0xf   : > { %p2171_p4 = por %p2592_p1, %p78_p0  ;;  %p345_p7 = scmp.lt.s32.totalorder %s2050_s24, 3 }
  0x10   : > { %p2176_p6 = por %p312_p3, %p78_p0  ;;  %s2052_s30 = smov [#allocation7]  }
  0x11   : > { %s2601_s27 = scalar_select %p2171_p4, 1, 0 }
  0x12   : > { %s2602_s28 = scalar_select %p2176_p6, 1, 0 }
  0x13   : > { %p2181_p8 = pnand %p1635_p5, %p345_p7  ;;  %s372_s13 = sshll.u32 %s2052_s30, 4  ;;  %s373_s13 = int_to_ptr.vmem [resolvable:$true] %s372_s13 }
  0x14   : > { %2603 = sst [smem:[#allocation15_spill]] %s2602_s28  ;;  %s2195_s15 = sadd.s32 1, %s2050_s24  }
  0x15   : > { %s2604_s29 = scalar_select %p2181_p8, 1, 0 }
  0x16   : > { %p1796_p9 = pneg %p2181_p8  ;;  %2606 = sst [smem:[#allocation16_spill]] %s2195_s15 }
  0x17   : > { %s65_s16 = sadd.s32 1, %s2046_s23  ;;  %s62_s17 = ssub.s32 %s2050_s24, %s2195_s15 }
  0x18   : > { %p2190_p11 = pnand %p1796_p9, %p2592_p1  ;;  %s1907_s18 = scalar_lea.vmem %s373_s13, 256 }
  0x19   : > { %p1908_p13 = scmp.ne.s32.totalorder %s373_s13, %s1907_s18  ;;  %p1915_p5 = scmp.lt.s32.totalorder %s373_s13, %s373_s13 }
  0x1a   : > { %p1898_p12 = pneg %p2190_p11  ;;  %p1916_p7 = scmp.lt.s32.totalorder %s1907_s18, %s1907_s18 }
  0x1c   : > { %p1910_p0 = pnand %p1908_p13, %p1898_p12  ;;  %p1917_p10 = por %p1916_p7, %p1915_p5 }
  0x1e   : > { %p1911_p3 = pneg %p1910_p0 }
  0x20   : > { %p1918_p2 = pnand %p1917_p10, %p1911_p3 }
  0x22   : > { %1921 = shalt.err (!%p1918_p2)
}
  0x23   : > { %s2053_s19 = smov 128   ;;  %s2054_s20 = smov 8  }
  0x24   : > { %s2607_s10 = sld [smem:[#allocation20_spill]]  ;;  %p63_p9 = scmp.eq.s32.totalorder %s62_s17, 0 }
  0x25   : > { %p72_p12 = scmp.ne.s32.totalorder %s2046_s23, %s2042_s22  ;;  %p73_p10 = scmp.eq.s32.totalorder %s2050_s24, 0 }
  0x26   : > { %p1812_p2 = scmp.lt.s32.totalorder %s2050_s24, 2  ;;  %p2609_p0 = scmp.eq.s32.totalorder %s2162_s25, 1 }
  0x27   : > { %s2212_s18 = scalar_select %p63_p9, %s2046_s23, %s65_s16  }
  0x28   : > { %p74_p13 = por %p73_p10, %p72_p12  ;;  %p2216_p3 = por %p2609_p0, %p72_p12 }
  0x29   : > { %2608 = sst [smem:[#allocation17_spill]] %s2212_s18  ;;  %s393_s28 = sand.u32 1, %s2046_s23  }
  0x2a   : > { %1799 = dma.hbm_to_vmem [thread:$0]  (!%p2190_p11), %s2607_s10, 256, %s373_s13, [#allocation6], %s2053_s19, %s2053_s19, %s2054_s20  }
  0x2b   : > { %s2610_s15 = scalar_select %p2216_p3, 1, 0 }
  0x2c   : > { %s1639_s21 = sshll.u32 %s2050_s24, 6  ;;  %s2222_s11 = sshll.u32 %s393_s28, 2 }
  0x2d   : > { %2611 = sst [smem:[#allocation18_spill]] %s2610_s15  ;;  %s2227_s13 = scalar_lea.hbm %s2571_s1, %s1639_s21 }
  0x2e   : > { %s397_s16 = scalar_lea.vmem [#allocation2], %s2222_s11  ;;  %p2230_p11 = pnand %p1812_p2, %p74_p13 }
  0x2f   : > { %s404_s17 = sshll.u32 %s397_s16, 4  ;;  %s2237_s30 = scalar_lea.hbm %s2573_s3, %s1639_s21  ;;  %s405_s17 = int_to_ptr.vmem [resolvable:$true] %s404_s17 }
  0x30   : > { %s394_s9 = scalar_lea.sflag [#allocation3], %s393_s28  ;;  %s1922_s14 = scalar_lea.hbm %s2227_s13, 64 }
  0x31   : > { %p1923_p5 = scmp.ne.s32.totalorder %s2227_s13, %s1922_s14  ;;  %p1924_p7 = pneg %p2230_p11 }
  0x32   : > { %s1927_s18 = scalar_lea.hbm %s2571_s1, 128  ;;  %p1928_p10 = scmp.lt.s32.totalorder %s2227_s13, %s2571_s1 }
  0x33   : > { %p1925_p9 = pnand %p1924_p7, %p1923_p5  ;;  %p1929_p2 = scmp.lt.s32.totalorder %s1927_s18, %s1922_s14 }
  0x35   : > { %p1926_p12 = pneg %p1925_p9  ;;  %p1930_p13 = por %p1929_p2, %p1928_p10 }
  0x37   : > { %p1931_p0 = pnand %p1930_p13, %p1926_p12 }
  0x39   : > { %1934 = shalt.err (!%p1931_p0)
}
  0x3a   : > { %s1935_s21 = scalar_lea.vmem %s405_s17, 64  ;;  %s2055_s28 = smov [#allocation2]  }
  0x3b   : > { %p1936_p1 = scmp.ne.s32.totalorder %s405_s17, %s1935_s21  ;;  %s1940_s20 = sshll.u32 %s2055_s28, 4  ;;  %s1941_s20 = int_to_ptr.vmem [resolvable:$false] %s1940_s20 }
  0x3c   : > { %s1942_s10 = scalar_lea.vmem %s1941_s20, 128  ;;  %p1943_p9 = scmp.lt.s32.totalorder %s405_s17, %s1941_s20 }
  0x3d   : > { %p1938_p6 = pnand %p1936_p1, %p1924_p7  ;;  %p1944_p3 = scmp.lt.s32.totalorder %s1942_s10, %s1935_s21 }
  0x3f   : > { %p1939_p5 = pneg %p1938_p6  ;;  %p1945_p4 = por %p1944_p3, %p1943_p9 }
  0x41   : > { %p1946_p8 = pnand %p1945_p4, %p1939_p5 }
  0x43   : > { %1949 = shalt.err (!%p1946_p8)
}
  0x44   : > { %1803 = dma.hbm_to_vmem [thread:$0]  (!%p2230_p11), %s2227_s13, 64, %s405_s17, %s394_s9  }
  0x45   : > { %s418_s23 = sand.u32 1, %s2050_s24   ;;  %s422_s15 = scalar_lea.vmem [#allocation5], %s2222_s11 }
  0x46   : > { %s429_s18 = sshll.u32 %s422_s15, 4  ;;  %s419_s26 = scalar_lea.sflag [#allocation6], %s418_s23  ;;  %s430_s18 = int_to_ptr.vmem [resolvable:$true] %s429_s18 }
  0x47   : > { %s1950_s14 = scalar_lea.hbm %s2237_s30, 64  ;;  %s1955_s28 = scalar_lea.hbm %s2573_s3, 128 }
  0x48   : > { %p1951_p1 = scmp.ne.s32.totalorder %s2237_s30, %s1950_s14  ;;  %p1956_p8 = scmp.lt.s32.totalorder %s2237_s30, %s2573_s3 }
  0x49   : > { %p1957_p3 = scmp.lt.s32.totalorder %s1955_s28, %s1950_s14 }
  0x4a   : > { %p1953_p4 = pnand %p1951_p1, %p1924_p7 }
  0x4b   : > { %p1958_p12 = por %p1957_p3, %p1956_p8 }
  0x4c   : > { %p1954_p6 = pneg %p1953_p4 }
  0x4e   : > { %p1959_p10 = pnand %p1958_p12, %p1954_p6 }
  0x50   : > { %1962 = shalt.err (!%p1959_p10)
}
  0x51   : > { %s1963_s11 = scalar_lea.vmem %s430_s18, 64  ;;  %s2056_s13 = smov [#allocation5]  }
  0x52   : > { %p1964_p2 = scmp.ne.s32.totalorder %s430_s18, %s1963_s11  ;;  %s1968_s17 = sshll.u32 %s2056_s13, 4  ;;  %s1969_s17 = int_to_ptr.vmem [resolvable:$false] %s1968_s17 }
  0x53   : > { %s1970_s9 = scalar_lea.vmem %s1969_s17, 128  ;;  %p1971_p5 = scmp.lt.s32.totalorder %s430_s18, %s1969_s17 }
  0x54   : > { %p1966_p13 = pnand %p1964_p2, %p1924_p7  ;;  %p1972_p9 = scmp.lt.s32.totalorder %s1970_s9, %s1963_s11 }
  0x56   : > { %p1967_p0 = pneg %p1966_p13  ;;  %p1973_p1 = por %p1972_p9, %p1971_p5 }
  0x58   : > { %p1974_p4 = pnand %p1973_p1, %p1967_p0 }
  0x5a   : > { %1977 = shalt.err (!%p1974_p4)
}
  0x5b   : > { %1806 = dma.hbm_to_vmem [thread:$0]  (!%p2230_p11), %s2237_s30, 64, %s430_s18, %s419_s26  }
  0x5c   : > { %p2613_p6 = scmp.ne.s32.totalorder %s2604_s29, 0 }
  0x5d   : > { %s2282_s23 = sand.u32 (!%p2613_p6), 1, %s2042_s22   ;;  %p2614_p7 = scmp.ne.s32.totalorder (!%p2613_p6), %s2601_s27, 0 }
  0x5e   : > { %445 = sbr.rel (%p2613_p6) target bundleno = 2654 (0xa5e), region = 64  ;;  %s1643_s15 = sshll.u32 (!%p2613_p6), %s2282_s23, 2 }
  0x5f   : > { %s448_s14 = scalar_lea.sflag (!%p2613_p6), [#allocation3], %s2282_s23  ;;  %s451_s16 = scalar_lea.vmem (!%p2613_p6), [#allocation2], %s1643_s15 }
  0x63   : > { %2021 = dma.done.wait (%p2614_p7), %s448_s14, 64  }
  0x64   : > { %2023 = vsyncadd (%p2614_p7), %s448_s14, 4294967232  ;;  %s456_s19 = sand.u32 1, %s2162_s25   ;;  %s2291_s29 = scalar_lea.vmem [#allocation5], %s1643_s15 }
  0x65   : > { %s457_s30 = scalar_lea.sflag [#allocation6], %s456_s19 }
  0x66   : > { %2025 = dma.done.wait (%p2614_p7), %s457_s30, 64  }
  0x67   : > { %2027 = vsyncadd (%p2614_p7), %s457_s30, 4294967232  ;;  %p2615_p11 = scmp.eq.s32.totalorder %s2162_s25, 0 }
  0x69   : > { %2029 = dma.done.wait (%p2615_p11), [#allocation6], 256   ;;  %p2616_p8 = pmov %p2615_p11 }
  0x6a   : > { %p525_p3 = scmp.lt.s32.totalorder %s2162_s25, 1  ;;  %v2057_v0 = vmov 0.0   ;;  %vm2058_vm0 = vmmov 0   ;;  %vm550_vm1 = vcmask 261120   ;;  %v1870_v3 = vld [vmem:[%s2575_s5 + $0x8] sm:$0xff]   ;;  %v1871_v4 = vld [vmem:[%s2575_s5] sm:$0xff]   ;;  %v565_v13 = vlaneseq }
  0x6b   : > { %2031 = vsyncadd (%p2616_p8), [#allocation6], 4294967040  ;;  %1706 = vmatprep.subr.bf16.mxu1 %v2057_v0  ;;  %1710 = vmatprep.mubr.msk.bf16.mxu1 %vm2058_vm0, %v2057_v0  ;;  %v545_v5 = vld [vmem:[%s451_s16] sm:$0xf]  ;;  %v1872_v11 = vld [vmem:[%s2576_s6 + $0x8] sm:$0xff]   ;;  %s2059_s16 = smov 112  }
  0x6c   : > { %s2306_s18 = scalar_select %p525_p3, %s2162_s25, 1  ;;  %1722 = vmatprep.subr.bf16.mxu0 %v2057_v0  ;;  %1724 = vmatprep.mubr.msk.bf16.mxu0 %vm2058_vm0, %v2057_v0  ;;  %v1873_v12 = vld [vmem:[%s2576_s6] sm:$0xff]   ;;  %v2339_v14 = vshrl.u32 %v565_v13, 7  ;;  %v2344_v16 = vld [vmem:[#allocation7] sm:$0xff]  ;;  %vm716_vm2 = vcmask 130048   ;;  %vm948_vm3 = vcmask 1043456  }
  0x6d   : > { %1707 = vmatpush3.bf16.msra.mxu1 %v1870_v3  ;;  %s2060_s19 = smov 96   ;;  %v2061_v50 = vmov 0   ;;  %v710_v52 = vld [vmem:[%s2291_s29] sm:$0xf]  ;;  %vm820_vm6 = vcmask 64512   ;;  %s2062_s17 = smov 16  }
  0x6e   : > { %s2312_s27 = sshll.u32 %s2306_s18, 3  ;;  %1708 = vmatprep.subr.bf16.mxu1 %v2057_v0  ;;  %v2342_v15 = vsub.s32 0, %v2339_v14  ;;  %v2350_v26 = vsub.s32 3, %v2339_v14  ;;  %v572_v27 = vsub.s32 4, %v2339_v14  ;;  %v2376_v42 = vsub.s32 1, %v2339_v14  ;;  %1868 = vset.pattern.permute.xlu1 %v2061_v50  ;;  %s2063_s9 = smov 8  }
  0x6f   : > { %s528_s28 = scalar_lea.vmem %s2570_s0, %s2312_s27  ;;  %1869 = vset.pattern.permute.xlu0 %v2061_v50  ;;  %vm814_vm4 = vcmp.gt.bf16.partialorder %v710_v52, 1056980736  ;;  %s532_s26 = scalar_lea.vmem %s2572_s2, %s2312_s27  ;;  %v1874_v52 = vld [vmem:[%s2577_s7 + $0x8] sm:$0xff]   ;;  %vm899_vm7 = vcmask 195584   ;;  %vm904_vm8 = vcmask 326656   ;;  %vm907_vm9 = vcmask 392192  }
  0x70   : > { %v544_v1 = vld [vmem:[%s528_s28] sm:$0xff]  ;;  %v583_v17 = vrot.slane %v2344_v16, %v2342_v15  ;;  %v568_v28 = vrot.slane %v2344_v16, %v2350_v26  ;;  %v573_v31 = vrot.slane %v2344_v16, %v572_v27  ;;  %v646_v43 = vrot.slane %v2344_v16, %v2376_v42  ;;  %s536_s20 = scalar_lea.vmem %s2574_s4, %s2312_s27  ;;  %s2064_s15 = smov 24  }
  0x71   : > { %v551_v2 = vsel %vm550_vm1, %v544_v1, 0.0  ;;  %1709 = vmatpush3.bf16.msra.mxu1 %v1871_v4  ;;  %v815_v53 = vsel %vm814_vm4, 65537, %v2061_v50  ;;  %s2065_s14 = smov 40   ;;  %s2066_s30 = smov 56   ;;  %vm910_vm10 = vcmask 457728   ;;  %vm913_vm11 = vcmask 523264  }
  0x72   : > { %552 = vadd.xlane.f32.xlu0 %v551_v2  ;;  %1714 = vmatprep.subr.bf16.mxu1 %v2057_v0  ;;  %v816_v54 = vunpack.c.l.b16 %v815_v53  ;;  %v1875_v53 = vld [vmem:[%s2577_s7] sm:$0xff]   ;;  %s2067_s29 = smov 72   ;;  %s2069_s21 = smov 104   ;;  %vm916_vm12 = vcmask 588800   ;;  %vm919_vm13 = vcmask 654336   ;;  %vm922_vm14 = vcmask 719872  }
  0x73   : > { %s2070_s28 = smov 120   ;;  %s2073_s11 = smov 64   ;;  %vm925_vm15 = vcmask 785408   ;;  %vm931_vm4 = vcmask 916480  }
  0x74   : > { %1711 = vmatmul.mubr.msk.bf16.vlgmr.msra.gmra.mxu1 %vm550_vm1, %v545_v5  ;;  %vm817_vm5 = vcmp.ne.s32.totalorder %v816_v54, 0 }
  0x75   : > { %1718 = vmatprep.mubr.msk.bf16.mxu1 %vm2058_vm0, %v2057_v0  ;;  %1715 = vmatpush3.bf16.msra.mxu1 %v1872_v11 }
  0x76   : > { %1716 = vmatprep.subr.bf16.mxu1 %v2057_v0 }
  0x79   : > { %1717 = vmatpush3.bf16.msra.mxu1 %v1873_v12 }
  0x7a   : > { %1728 = vmatprep.subr.bf16.mxu1 %v2057_v0 }
  0xfb   : > { %v553_v6 = vpop.xlane.xlu0 %552 }
  0xfc   : > { %v555_v7 = vmul.f32 0.03125, %v553_v6 }
  0xfe   : > { %v556_v8 = vsub.f32 %v544_v1, %v555_v7 }
 0x100   : > { %v557_v9 = vmul.f32 %v556_v8, %v556_v8 }
 0x102   : > { %v558_v10 = vsel %vm550_vm1, %v557_v9, 0.0 }
 0x103   : > { %559 = vadd.xlane.f32.xlu1 %v558_v10 }
 0x134   : > { %v633_v18 = vpop.f32.mrf.mxu1 }
 0x135   : > { %v634_v19 = vadd.f32 %v633_v18, %v583_v17 }
 0x136   : > { %v1712_v20 = vpop.f32.mrf.mxu1 }
 0x137   : > { %703 = vrot.lane.b32.xlu0 %v634_v19, %s2059_s16  ;;  %v711_v37 = vpack.c.bf16 %v634_v19, %v634_v19  ;;  %v546_v19 = vld [vmem:[%s532_s26] sm:$0xff]  ;;  %s2068_s26 = smov 88  }
 0x138   : > { %v636_v21 = vpop.f32.mrf.mxu1  ;;  %v1048_v20 = vmul.f32 %v546_v19, %v546_v19 }
 0x13a   : > { %v1713_v22 = vpop.f32.mrf.mxu1  ;;  %v1139_v21 = vmul.f32 0.5, %v1048_v20 }
 0x18c   : > { %v560_v23 = vpop.xlane.xlu1 %559 }
 0x18d   : > { %v561_v24 = vmul.f32 0.03125, %v560_v23 }
 0x18f   : > { %v562_v25 = vadd.f32 1e-05, %v561_v24 }
 0x191   : > { %1882 = vrsqrt.f32 %v562_v25 }
 0x19e   : > { %v1883_v29 = vpop.eup %1882 }
 0x19f   : > { %v564_v30 = vmul.f32 %v1883_v29, %v556_v8 }
 0x1a1   : > { %v569_v32 = vmul.f32 %v568_v28, %v564_v30 }
 0x1a3   : > { %v2356_v33 = vadd.f32 %v573_v31, %v569_v32 }
 0x1a5   : > { %v575_v34 = vpack.c.bf16 %v2356_v33, %v2356_v33 }
 0x1a7   : > { %1719 = vmatmul.mubr.msk.bf16.vlgmr.msra.gmra.mxu1 %vm550_vm1, %v575_v34 }
 0x1a8   : > { %1730 = vmatprep.mubr.msk.bf16.mxu1 %vm2058_vm0, %v2057_v0 }
 0x1a9   : > { %v704_v35 = vpop.permute.xlu0 %703 }
 0x1aa   : > { %v712_v36 = vpack.c.bf16 %v704_v35, %v704_v35  ;;  %v547_v35 = vld [vmem:[%s536_s20] sm:$0xff]  ;;  %s2071_s20 = smov 32  }
 0x1ac   : > { %764 = vrot.lane.b32.xlu1 %v712_v36, %s2060_s19 }
 0x1b0   : > { %714 = vrot.lane.b32.xlu1 %v711_v37, %s2060_s19 }
 0x21e   : > { %v765_v38 = vpop.permute.xlu1 %764 }
 0x21f   : > { %v770_v39 = vsel %vm716_vm2, %v765_v38, 0 }
 0x220   : > { %1729 = vmatpush3.bf16.xpose.msra.mxu1 %v770_v39 }
 0x221   : > { %1740 = vmatprep.subr.bf16.mxu1 %v2057_v0 }
 0x222   : > { %v715_v40 = vpop.permute.xlu1 %714 }
 0x223   : > { %v721_v41 = vsel %vm716_vm2, %v715_v40, 0 }
 0x224   : > { %1723 = vmatpush3.bf16.xpose.msra.mxu0 %v721_v41 }
 0x225   : > { %1734 = vmatprep.subr.bf16.mxu0 %v2057_v0 }
 0x227   : > { %1731 = vmatmul.mubr.msk.bf16.vlgmr.msra.gmra.mxu1 %vm716_vm2, %v712_v36 }
 0x228   : > { %1742 = vmatprep.mubr.msk.bf16.mxu1 %vm2058_vm0, %v2057_v0 }
 0x22b   : > { %1725 = vmatmul.mubr.msk.bf16.vlgmr.msra.gmra.mxu0 %vm716_vm2, %v711_v37 }
 0x22c   : > { %1736 = vmatprep.mubr.msk.bf16.mxu0 %vm2058_vm0, %v2057_v0 }
 0x267   : > { %v696_v44 = vpop.f32.mrf.mxu1 }
 0x268   : > { %v2380_v45 = vadd.f32 %v696_v44, %v646_v43 }
 0x269   : > { %v1720_v46 = vpop.f32.mrf.mxu1 }
 0x26a   : > { %v944_v47 = vpack.c.bf16 %v2380_v45, %v2380_v45 }
 0x26b   : > { %v699_v48 = vpop.f32.mrf.mxu1 }
 0x26c   : > { %v950_v49 = vsel %vm948_vm3, %v944_v47, 0 }
 0x26d   : > { %v1721_v51 = vpop.f32.mrf.mxu1  ;;  %1735 = vmatpush3.bf16.msra.mxu0 %v950_v49 }
 0x26e   : > { %1746 = vmatprep.subr.bf16.mxu0 %v2057_v0 }
 0x2e7   : > { %v806_v55 = vpop.f32.mrf.mxu1 }
 0x2e8   : > { %v813_v56 = vmul.f32 0.25, %v806_v55 }
 0x2e9   : > { %v1732_v57 = vpop.f32.mrf.mxu1 }
 0x2ea   : > { %v819_v58 = vsel %vm817_vm5, -1e+09, %v813_v56 }
 0x2eb   : > { %v757_v59 = vpop.f32.mrf.mxu0  ;;  %v809_v60 = vpop.f32.mrf.mxu1  ;;  %v824_v61 = vsel %vm820_vm6, %v819_v58, -inf }
 0x2ec   : > { %v812_v62 = vmul.f32 0.25, %v757_v59  ;;  %825 = vmax.xlane.f32.xlu1 %v824_v61 }
 0x2ed   : > { %v1726_v63 = vpop.f32.mrf.mxu0  ;;  %v1733_v1 = vpop.f32.mrf.mxu1 }
 0x2ee   : > { %v818_v2 = vsel %vm817_vm5, -1e+09, %v812_v62  ;;  %vm934_vm5 = vcmask 982016  }
 0x2ef   : > { %v760_v3 = vpop.f32.mrf.mxu0  ;;  %v821_v4 = vsel %vm820_vm6, %v818_v2, -inf }
 0x2f0   : > { %822 = vmax.xlane.f32.xlu0 %v821_v4 }
 0x2f1   : > { %v1727_v5 = vpop.f32.mrf.mxu0 }
 0x375   : > { %v826_v6 = vpop.xlane.xlu1 %825 }
 0x376   : > { %v828_v7 = vsub.f32 %v819_v58, %v826_v6 }
 0x378   : > { %v831_v8 = vmul.f32 1.442695, %v828_v7 }
 0x379   : > { %v823_v9 = vpop.xlane.xlu0 %822 }
 0x37a   : > { %1884 = vpow2.f32 %v831_v8  ;;  %v827_v10 = vsub.f32 %v818_v2, %v823_v9 }
 0x37c   : > { %v829_v11 = vmul.f32 1.442695, %v827_v10 }
 0x37e   : > { %1886 = vpow2.f32 %v829_v11 }
 0x387   : > { %v1885_v12 = vpop.eup %1884 }
 0x388   : > { %v836_v13 = vsel %vm820_vm6, %v1885_v12, 0.0 }
 0x389   : > { %837 = vadd.xlane.f32.xlu0 %v836_v13 }
 0x38b   : > { %v1887_v17 = vpop.eup %1886 }
 0x38c   : > { %v833_v18 = vsel %vm820_vm6, %v1887_v17, 0.0 }
 0x38d   : > { %834 = vadd.xlane.f32.xlu1 %v833_v18 }
 0x39e   : > { %1041 = vperm.xlu1 %1868, %v546_v19  }
 0x39f   : > { %707 = vrot.lane.b32.xlu0 %v2380_v45, %s2059_s16 }
 0x3a2   : > { %1142 = vperm.xlu1 %1868, %v1139_v21  }
 0x3a6   : > { %1222 = vperm.xlu1 %1868, %v547_v35  }
 0x412   : > { %v838_v22 = vpop.xlane.xlu0 %837 }
 0x413   : > { %1888 = vrcp.f32 %v838_v22 }
 0x416   : > { %v708_v23 = vpop.permute.xlu0 %707  ;;  %v835_v24 = vpop.xlane.xlu1 %834 }
 0x417   : > { %v945_v25 = vpack.c.bf16 %v708_v23, %v708_v23  ;;  %1890 = vrcp.f32 %v835_v24 }
 0x419   : > { %v995_v27 = vsel %vm948_vm3, %v945_v25, 0 }
 0x41a   : > { %1741 = vmatpush3.bf16.msra.mxu1 %v995_v27  ;;  %v1042_v54 = vpop.permute.xlu1 %1041 }
 0x41b   : > { %1752 = vmatprep.subr.bf16.mxu1 %v2057_v0 }
 0x41e   : > { %v1143_v58 = vpop.permute.xlu1 %1142 }
 0x420   : > { %v1889_v28 = vpop.eup %1888 }
 0x421   : > { %v842_v29 = vmul.f32 %v1889_v28, %v1885_v12 }
 0x422   : > { %v2448_v21 = vpop.permute.xlu1 %1222 }
 0x423   : > { %v2399_v30 = vpack.c.bf16 %v842_v29, %v842_v29 }
 0x424   : > { %v1891_v31 = vpop.eup %1890 }
 0x425   : > { %v841_v32 = vmul.f32 %v1891_v31, %v1887_v17  ;;  %1743 = vmatmul.mubr.msk.bf16.vlgmr.msra.gmra.mxu1 %vm820_vm6, %v2399_v30  ;;  %v2443_v17 = vsub.s32 2, %v2339_v14 }
 0x426   : > { %1754 = vmatprep.mubr.msk.bf16.mxu1 %vm2058_vm0, %v2057_v0 }
 0x427   : > { %v2405_v34 = vpack.c.bf16 %v841_v32, %v841_v32  ;;  %v1157_v18 = vrot.slane %v2344_v16, %v2443_v17  ;;  %v873_v32 = vshrl.u32 %v2399_v30, 16 }
 0x429   : > { %1737 = vmatmul.mubr.msk.bf16.vlgmr.msra.gmra.mxu0 %vm820_vm6, %v2405_v34  ;;  %v1158_v19 = vadd.f32 %v1157_v18, %v2356_v33  ;;  %v846_v28 = vshrl.u32 %v2405_v34, 16  ;;  %v880_v35 = vrot.slane %v873_v32, 1 }
 0x42a   : > { %1748 = vmatprep.mubr.msk.bf16.mxu0 %vm2058_vm0, %v2057_v0 }
 0x42b   : > { %v854_v29 = vrot.slane %v846_v28, 1  ;;  %v860_v33 = vrot.slane %v846_v28, 2  ;;  %v866_v31 = vrot.slane %v846_v28, 3 }
 0x4e5   : > { %v1031_v36 = vpop.f32.mrf.mxu1 }
 0x4e6   : > { %v1038_v37 = vsub.f32 %v1031_v36, %v708_v23  ;;  %v886_v36 = vrot.slane %v873_v32, 2 }
 0x4e7   : > { %v1744_v38 = vpop.f32.mrf.mxu1 }
 0x4e8   : > { %v1050_v39 = vpack.c.bf16 %v1038_v37, %v1038_v37  ;;  %v1045_v55 = vmul.f32 %v1042_v54, %v1038_v37  ;;  %v892_v38 = vrot.slane %v873_v32, 3 }
 0x4e9   : > { %v986_v40 = vpop.f32.mrf.mxu0  ;;  %v1034_v41 = vpop.f32.mrf.mxu1 }
 0x4ea   : > { %v1037_v43 = vsub.f32 %v986_v40, %v2380_v45  ;;  %v1095_v44 = vsel %vm948_vm3, %v1050_v39, 0  ;;  %v1047_v60 = vadd.f32 %v1045_v55, %v708_v23 }
 0x4eb   : > { %v1738_v46 = vpop.f32.mrf.mxu0  ;;  %v1745_v47 = vpop.f32.mrf.mxu1  ;;  %1753 = vmatpush3.bf16.msra.mxu1 %v1095_v44 }
 0x4ec   : > { %v1049_v48 = vpack.c.bf16 %v1037_v43, %v1037_v43  ;;  %1766 = vmatprep.subr.bf16.mxu1 %v2057_v0  ;;  %v1044_v7 = vmul.f32 %v1042_v54, %v1037_v43  ;;  %v851_v46 = vrot.slane %v2405_v34, 1  ;;  %v857_v47 = vrot.slane %v2405_v34, 2 }
 0x4ed   : > { %v989_v49 = vpop.f32.mrf.mxu0 }
 0x4ee   : > { %1755 = vmatmul.mubr.msk.bf16.vlgmr.msra.gmra.mxu1 %vm820_vm6, %v2399_v30  ;;  %v1052_v50 = vsel %vm948_vm3, %v1049_v48, 0  ;;  %v1046_v9 = vadd.f32 %v1044_v7, %v2380_v45  ;;  %v863_v48 = vrot.slane %v2405_v34, 3  ;;  %v1876_v49 = vld [vmem:[%s2578_s8 + $0x8] sm:$0xff]   ;;  %v1241_v7 = vsub.s32 5, %v2339_v14 }
 0x4ef   : > { %v1739_v51 = vpop.f32.mrf.mxu0  ;;  %1747 = vmatpush3.bf16.msra.mxu0 %v1052_v50  ;;  %1770 = vmatprep.mubr.msk.bf16.mxu1 %vm2058_vm0, %v2057_v0  ;;  %v1877_v50 = vld [vmem:[%s2578_s8] sm:$0xff]   ;;  %vm939_vm3 = vsmask.f32 256 }
 0x4f0   : > { %1758 = vmatprep.subr.bf16.mxu0 %v2057_v0  ;;  %1767 = vmatpush3.bf16.msra.mxu1 %v1876_v49  ;;  %v877_v51 = vrot.slane %v2399_v30, 1 }
 0x4f1   : > { %1768 = vmatprep.subr.bf16.mxu1 %v2057_v0 }
 0x4f2   : > { %1749 = vmatmul.mubr.msk.bf16.vlgmr.msra.gmra.mxu0 %vm820_vm6, %v2405_v34 }
 0x4f3   : > { %1762 = vmatprep.mubr.msk.bf16.mxu0 %vm2058_vm0, %v2057_v0  ;;  %1759 = vmatpush3.bf16.msra.mxu0 %v1874_v52  ;;  %v883_v52 = vrot.slane %v2399_v30, 2 }
 0x4f4   : > { %1760 = vmatprep.subr.bf16.mxu0 %v2057_v0  ;;  %1769 = vmatpush3.bf16.msra.mxu1 %v1877_v50 }
 0x4f7   : > { %1761 = vmatpush3.bf16.msra.mxu0 %v1875_v53 }
 0x4f8   : > { %1774 = vmatprep.subr.bf16.mxu0 %v2057_v0 }
 0x5ae   : > { %v1131_v56 = vpop.f32.mrf.mxu1 }
 0x5af   : > { %v1138_v57 = vsub.f32 %v1131_v56, %v1038_v37  ;;  %v889_v37 = vrot.slane %v2399_v30, 3 }
 0x5b0   : > { %v1756_v59 = vpop.f32.mrf.mxu1 }
 0x5b1   : > { %v1146_v61 = vmul.f32 %v1143_v58, %v1138_v57 }
 0x5b2   : > { %v1088_v62 = vpop.f32.mrf.mxu0  ;;  %v1134_v63 = vpop.f32.mrf.mxu1 }
 0x5b3   : > { %v1148_v1 = vadd.f32 %v1146_v61, %v1047_v60  ;;  %v1137_v6 = vsub.f32 %v1088_v62, %v1037_v43 }
 0x5b4   : > { %v1750_v2 = vpop.f32.mrf.mxu0  ;;  %v1757_v3 = vpop.f32.mrf.mxu1 }
 0x5b5   : > { %1150 = vrot.lane.b32.xlu0 %v1148_v1, %s2062_s17  ;;  %v1145_v8 = vmul.f32 %v1143_v58, %v1137_v6 }
 0x5b6   : > { %v1091_v4 = vpop.f32.mrf.mxu0 }
 0x5b7   : > { %v1147_v10 = vadd.f32 %v1145_v8, %v1046_v9  ;;  %v1246_v8 = vsub.s32 6, %v2339_v14 }
 0x5b8   : > { %v1751_v5 = vpop.f32.mrf.mxu0 }
 0x627   : > { %v1151_v11 = vpop.permute.xlu0 %1150 }
 0x628   : > { %v1153_v12 = vsel %vm716_vm2, %v1147_v10, %v1151_v11 }
 0x629   : > { %v1159_v13 = vpack.c.bf16 %v1153_v12, %v1153_v12  ;;  %v1242_v12 = vrot.slane %v2344_v16, %v1241_v7 }
 0x62b   : > { %1763 = vmatmul.mubr.msk.bf16.vlgmr.msra.gmra.mxu0 %vm550_vm1, %v1159_v13 }
 0x62c   : > { %1782 = vmatprep.mubr.msk.bf16.mxu0 %vm2058_vm0, %v2057_v0  ;;  %vm928_vm0 = vcmask 850944  }
 0x6eb   : > { %v1213_v20 = vpop.f32.mrf.mxu0 }
 0x6ec   : > { %v1219_v45 = vadd.f32 %v1213_v20, %v1158_v19  ;;  %v1247_v19 = vrot.slane %v2344_v16, %v1246_v8 }
 0x6ed   : > { %v1764_v22 = vpop.f32.mrf.mxu0 }
 0x6ee   : > { %v2451_v23 = vmul.f32 %v2448_v21, %v1219_v45 }
 0x6ef   : > { %v1216_v24 = vpop.f32.mrf.mxu0 }
 0x6f0   : > { %v1226_v25 = vsel %vm550_vm1, %v2451_v23, 0.0 }
 0x6f1   : > { %v1765_v27 = vpop.f32.mrf.mxu0  ;;  %1227 = vadd.xlane.f32.xlu0 %v1226_v25 }
 0x707   : > { %848 = vrot.lane.b32.xlu0 %v846_v28, %s2063_s9  ;;  %s2074_s9 = smov 80  }
 0x70b   : > { %855 = vrot.lane.b32.xlu0 %v854_v29, %s2064_s15  ;;  %s1674_s15 = sshll.u32 %s2162_s25, 5  ;;  %s2075_s25 = smov [#allocation8]  }
 0x70f   : > { %861 = vrot.lane.b32.xlu0 %v860_v33, %s2065_s14 }
 0x713   : > { %867 = vrot.lane.b32.xlu0 %v866_v31, %s2066_s30  ;;  %s539_s30 = scalar_lea.vmem %s2582_s12, %s2306_s18  ;;  %s2619_s18 = sld [smem:[#allocation21_spill]] }
 0x717   : > { %875 = vrot.lane.b32.xlu0 %v873_v32, %s2067_s29  ;;  %v941_v32 = vld [vmem:[%s539_s30] sm:$0x1] }
 0x719   : > { %s2532_s29 = scalar_lea.hbm %s2619_s18, %s1674_s15 }
 0x71b   : > { %881 = vrot.lane.b32.xlu0 %v880_v35, %s2068_s26  ;;  %s2617_s26 = sld [smem:[#allocation19_spill]] }
 0x71f   : > { %887 = vrot.lane.b32.xlu0 %v886_v36, %s2069_s21 }
 0x723   : > { %890 = vrot.lane.b32.xlu0 %v889_v37, %s2059_s16  ;;  %s2072_s16 = smov 48  }
 0x727   : > { %893 = vrot.lane.b32.xlu0 %v892_v38, %s2070_s28  ;;  %s1982_s28 = sshll.u32 %s2075_s25, 4  ;;  %s1983_s28 = int_to_ptr.vmem [resolvable:$false] %s1982_s28 }
 0x77a   : > { %v1228_v39 = vpop.xlane.xlu0 %1227 }
 0x77b   : > { %v1229_v40 = vmul.f32 0.03125, %v1228_v39 }
 0x77d   : > { %v1230_v41 = vsub.f32 %v2451_v23, %v1229_v40  ;;  %v1878_v40 = vld [vmem:[%s2617_s26 + $0x18] sm:$0xff]  }
 0x77e   : > { %v849_v53 = vpop.permute.xlu0 %848  ;;  %1775 = vmatpush3.bf16.msra.mxu0 %v1878_v40 }
 0x77f   : > { %v1231_v43 = vmul.f32 %v1230_v41, %v1230_v41  ;;  %v896_v61 = vsel %vm820_vm6, %v2405_v34, %v849_v53  ;;  %1776 = vmatprep.subr.bf16.mxu0 %v2057_v0 }
 0x781   : > { %v1232_v44 = vsel %vm550_vm1, %v1231_v43, 0.0  ;;  %v1880_v43 = vld [vmem:[%s2617_s26 + $0x8] sm:$0xff]  }
 0x782   : > { %1233 = vadd.xlane.f32.xlu1 %v1232_v44  ;;  %v856_v54 = vpop.permute.xlu0 %855  ;;  %v1881_v44 = vld [vmem:[%s2617_s26] sm:$0xff]  }
 0x786   : > { %v862_v55 = vpop.permute.xlu0 %861 }
 0x78a   : > { %v868_v56 = vpop.permute.xlu0 %867 }
 0x78e   : > { %v876_v59 = vpop.permute.xlu0 %875 }
 0x792   : > { %v882_v2 = vpop.permute.xlu0 %881 }
 0x793   : > { %852 = vrot.lane.b32.xlu1 %v851_v46, %s2062_s17  ;;  %v1256_v46 = vsub.s32 7, %v2339_v14  ;;  %v549_v14 = vld [vmem:[#allocation7 + $0x8] sm:$0xff]  ;;  %s1646_s17 = sshll.u32 %s2282_s23, 1 }
 0x794   : > { %s519_s14 = scalar_lea.vmem [#allocation8], %s1646_s17 }
 0x796   : > { %v888_v34 = vpop.permute.xlu0 %887 }
 0x797   : > { %858 = vrot.lane.b32.xlu1 %v857_v47, %s2071_s20  ;;  %v1257_v47 = vrot.slane %v2344_v16, %v1256_v46  ;;  %v1334_v16 = vrot.slane %v549_v14, %v2342_v15 }
 0x79a   : > { %v891_v22 = vpop.permute.xlu0 %890 }
 0x79b   : > { %864 = vrot.lane.b32.xlu1 %v863_v48, %s2072_s16  ;;  %s1984_s16 = scalar_lea.vmem %s1983_s28, 64 }
 0x79e   : > { %v894_v36 = vpop.permute.xlu0 %893 }
 0x79f   : > { %870 = vrot.lane.b32.xlu1 %v2399_v30, %s2073_s11 }
 0x7a3   : > { %878 = vrot.lane.b32.xlu1 %v877_v51, %s2074_s9  ;;  %s2618_s9 = sld [smem:[#allocation18_spill]] }
 0x7a7   : > { %884 = vrot.lane.b32.xlu1 %v883_v52, %s2060_s19 }
 0x7a9   : > { %p2620_p10 = scmp.ne.s32.totalorder %s2618_s9, 0 }
 0x80b   : > { %v1234_v57 = vpop.xlane.xlu1 %1233 }
 0x80c   : > { %v1235_v58 = vmul.f32 0.03125, %v1234_v57 }
 0x80e   : > { %v1236_v60 = vadd.f32 1e-05, %v1235_v58 }
 0x80f   : > { %v853_v62 = vpop.permute.xlu1 %852 }
 0x810   : > { %1892 = vrsqrt.f32 %v1236_v60  ;;  %v898_v63 = vsel %vm716_vm2, %v896_v61, %v853_v62  ;;  %vm938_vm2 = vcmask 1040384  }
 0x811   : > { %v901_v30 = vsel %vm899_vm7, %v898_v63, %v856_v54  ;;  %vm940_vm6 = vmand %vm938_vm2, %vm939_vm3  ;;  %vm1414_vm7 = vcmask 1041409  }
 0x813   : > { %v859_v1 = vpop.permute.xlu1 %858 }
 0x814   : > { %v903_v3 = vsel %vm550_vm1, %v901_v30, %v859_v1 }
 0x815   : > { %v906_v5 = vsel %vm904_vm8, %v903_v3, %v862_v55 }
 0x817   : > { %v865_v4 = vpop.permute.xlu1 %864 }
 0x818   : > { %v909_v6 = vsel %vm907_vm9, %v906_v5, %v865_v4 }
 0x819   : > { %v912_v10 = vsel %vm910_vm10, %v909_v6, %v868_v56 }
 0x81b   : > { %v871_v9 = vpop.permute.xlu1 %870 }
 0x81c   : > { %v915_v11 = vsel %vm913_vm11, %v912_v10, %v871_v9 }
 0x81d   : > { %v1893_v13 = vpop.eup %1892  ;;  %v918_v45 = vsel %vm916_vm12, %v915_v11, %v876_v59 }
 0x81e   : > { %v1238_v18 = vmul.f32 %v1893_v13, %v1230_v41  ;;  %v1879_v41 = vld [vmem:[%s2617_s26 + $0x10] sm:$0xff]  }
 0x81f   : > { %v879_v20 = vpop.permute.xlu1 %878  ;;  %1777 = vmatpush3.bf16.msra.mxu0 %v1879_v41 }
 0x820   : > { %v921_v24 = vsel %vm919_vm13, %v918_v45, %v879_v20  ;;  %v1243_v25 = vmul.f32 %v1242_v12, %v1238_v18  ;;  %1778 = vmatprep.subr.bf16.mxu0 %v2057_v0 }
 0x821   : > { %v924_v29 = vsel %vm922_vm14, %v921_v24, %v882_v2 }
 0x822   : > { %v1248_v27 = vadd.f32 %v1247_v19, %v1243_v25 }
 0x823   : > { %v885_v28 = vpop.permute.xlu1 %884  ;;  %1779 = vmatpush3.bf16.msra.mxu0 %v1880_v43 }
 0x824   : > { %v927_v33 = vsel %vm925_vm15, %v924_v29, %v885_v28  ;;  %v1249_v31 = vpack.c.bf16 %v1248_v27, %v1248_v27  ;;  %1780 = vmatprep.subr.bf16.mxu0 %v2057_v0 }
 0x825   : > { %v930_v35 = vsel %vm928_vm0, %v927_v33, %v888_v34 }
 0x826   : > { %v933_v37 = vsel %vm931_vm4, %v930_v35, %v891_v22  ;;  %1771 = vmatmul.mubr.msk.bf16.vlgmr.msra.gmra.mxu1 %vm550_vm1, %v1249_v31 }
 0x827   : > { %v936_v38 = vsel %vm934_vm5, %v933_v37, %v894_v36  ;;  %1781 = vmatpush3.bf16.msra.mxu0 %v1881_v44 }
 0x828   : > { %v942_v39 = vsel %vm940_vm6, %v936_v38, %v941_v32 }
 0x829   : > { %943 = vst [vmem:[%s539_s30] sm:$0x1] %v942_v39 }
 0x8e6   : > { %v1307_v48 = vpop.f32.mrf.mxu1 }
 0x8e7   : > { %v1308_v49 = vadd.f32 %v1307_v48, %v1257_v47 }
 0x8e8   : > { %v1772_v50 = vpop.f32.mrf.mxu1 }
 0x8e9   : > { %v1313_v51 = vmul.f32 %v1308_v49, %v1308_v49 }
 0x8ea   : > { %v1310_v52 = vpop.f32.mrf.mxu1 }
 0x8eb   : > { %v1314_v53 = vmul.f32 %v1313_v51, %v1308_v49 }
 0x8ec   : > { %v1773_v54 = vpop.f32.mrf.mxu1 }
 0x8ed   : > { %v1315_v55 = vmul.f32 0.044715, %v1314_v53 }
 0x8ef   : > { %v1316_v56 = vadd.f32 %v1315_v55, %v1308_v49 }
 0x8f1   : > { %v1317_v57 = vmul.f32 0.7978846, %v1316_v56 }
 0x8f3   : > { %1894 = vtanh.f32 %v1317_v57 }
 0x900   : > { %v1895_v0 = vpop.eup %1894 }
 0x901   : > { %v1319_v58 = vadd.f32 1.0, %v1895_v0 }
 0x903   : > { %v1320_v59 = vmul.f32 0.5, %v1319_v58 }
 0x905   : > { %v1321_v60 = vmul.f32 %v1320_v59, %v1308_v49 }
 0x907   : > { %v1322_v61 = vpack.c.bf16 %v1321_v60, %v1321_v60 }
 0x909   : > { %1783 = vmatmul.mubr.msk.bf16.vlgmr.msra.gmra.mxu0 %vm913_vm11, %v1322_v61 }
 0x9c9   : > { %v1396_v62 = vpop.f32.mrf.mxu0 }
 0x9ca   : > { %v1397_v63 = vadd.f32 %v1396_v62, %v1334_v16 }
 0x9cb   : > { %v1784_v1 = vpop.f32.mrf.mxu0 }
 0x9cc   : > { %v1402_v30 = vadd.f32 %v1397_v63, %v2451_v23 }
 0x9cd   : > { %v1399_v2 = vpop.f32.mrf.mxu0 }
 0x9ce   : > { %v1403_v3 = vmul.f32 %v1402_v30, %v2448_v21 }
 0x9cf   : > { %v1785_v4 = vpop.f32.mrf.mxu0 }
 0x9d0   : > { %v1405_v5 = vcombine.high %v1403_v3, %v1403_v3  ;;  %v1420_v6 = vrot.slane %v1403_v3, %v2376_v42  ;;  %v1409_v34 = vrot.slane %v1403_v3, %v2342_v15  ;;  %v1432_v21 = vrot.slane %v1403_v3, %v2443_v17 }
 0x9d2   : > { %v1424_v7 = vrot.slane %v1405_v5, %v2376_v42  ;;  %v1413_v8 = vrot.slane %v1405_v5, %v2342_v15  ;;  %v1436_v10 = vrot.slane %v1405_v5, %v2443_v17  ;;  %v1448_v12 = vrot.slane %v1405_v5, %v2350_v26 }
 0x9d3   : > { %v1444_v42 = vrot.slane %v1403_v3, %v2350_v26 }
 0x9d4   : > { %v1425_v9 = vsel %vm1414_vm7, %v1424_v7, %v1420_v6  ;;  %v1415_v23 = vsel %vm1414_vm7, %v1413_v8, %v1409_v34  ;;  %v1437_v11 = vsel %vm1414_vm7, %v1436_v10, %v1432_v21 }
 0x9d5   : > { %1426 = vrot.lane.b32.xlu1 %v1425_v9, %s2071_s20  ;;  %v1449_v13 = vsel %vm1414_vm7, %v1448_v12, %v1444_v42  ;;  %s1474_s20 = sshll.u32 %s519_s14, 4  ;;  %s1475_s20 = int_to_ptr.vmem [resolvable:$true] %s1474_s20 }
 0x9d6   : > { %s1978_s21 = scalar_lea.vmem %s1475_s20, 32  ;;  %p1985_p0 = scmp.lt.s32.totalorder %s1475_s20, %s1983_s28 }
 0x9d7   : > { %p1979_p12 = scmp.ne.s32.totalorder %s1475_s20, %s1978_s21  ;;  %p1986_p5 = scmp.lt.s32.totalorder %s1984_s16, %s1978_s21 }
 0x9d9   : > { %1438 = vrot.lane.b32.xlu1 %v1437_v11, %s2073_s11  ;;  %p1980_p2 = pnand %p1979_p12, %p2620_p10  ;;  %p1987_p9 = por %p1986_p5, %p1985_p0 }
 0x9db   : > { %p1981_p13 = pneg %p1980_p2 }
 0x9dd   : > { %1450 = vrot.lane.b32.xlu1 %v1449_v13, %s2060_s19  ;;  %s1458_s19 = scalar_lea.sflag [#allocation4], %s2282_s23  ;;  %p1988_p1 = pnand %p1987_p9, %p1981_p13 }
 0xa47   : > { %v1427_v15 = vpop.permute.xlu1 %1426 }
 0xa48   : > { %v1453_v17 = vsel %vm550_vm1, %v1415_v23, %v1427_v15 }
 0xa4b   : > { %v1439_v18 = vpop.permute.xlu1 %1438 }
 0xa4c   : > { %v1454_v19 = vsel %vm913_vm11, %v1453_v17, %v1439_v18 }
 0xa4f   : > { %v1451_v20 = vpop.permute.xlu1 %1450 }
 0xa50   : > { %v1455_v26 = vsel %vm925_vm15, %v1454_v19, %v1451_v20 }
 0xa51   : > { %1456 = vst [vmem:[%s519_s14] sm:$0x3] %v1455_v26 }
 0xa52   : > { %1991 = shalt.err (!%p1988_p1)
}
 0xa53   : > { %s1992_s27 = scalar_lea.hbm %s2532_s29, 32  ;;  %s1996_s13 = scalar_lea.hbm %s2619_s18, 64 }
 0xa54   : > { %p1993_p4 = scmp.ne.s32.totalorder %s2532_s29, %s1992_s27  ;;  %p1997_p11 = scmp.lt.s32.totalorder %s2532_s29, %s2619_s18 }
 0xa55   : > { %p1998_p8 = scmp.lt.s32.totalorder %s1996_s13, %s1992_s27 }
 0xa56   : > { %p1994_p6 = pnand %p1993_p4, %p2620_p10 }
 0xa57   : > { %p1999_p3 = por %p1998_p8, %p1997_p11 }
 0xa58   : > { %p1995_p7 = pneg %p1994_p6 }
 0xa5a   : > { %p2000_p12 = pnand %p1999_p3, %p1995_p7 }
 0xa5c   : > { %2003 = shalt.err (!%p2000_p12)
}
 0xa5d   : > { %1794 = dma.vmem_to_hbm [thread:$0]  (%p2620_p10), %s1475_s20, 32, %s2532_s29, %s1458_s19  }
 0xa5e PF: > { %s2621_s14 = sld [smem:[#allocation13_spill]]  ;;  %p2624_p13 = scmp.ge.s32.totalorder %s2050_s24, 2 }
 0xa5f   : > { %s2622_s30 = sld [smem:[#allocation15_spill]] }
 0xa64   : > { %s1489_s11 = sand.u32 1, %s2621_s14  }
 0xa65   : > { %p2623_p2 = scmp.ne.s32.totalorder %s2622_s30, 0  ;;  %s1490_s21 = scalar_lea.sflag [#allocation4], %s1489_s11 }
 0xa67   : > { %p1808_p0 = pnand %p2624_p13, %p2623_p2 }
 0xa69   : > { %p1809_p5 = pneg %p1808_p0 }
 0xa6b   : > { %2033 = dma.done.wait (%p1809_p5), %s1490_s21, 32  }
 0xa6c   : > { %2035 = vsyncadd (%p1809_p5), %s1490_s21, 4294967264  ;;  %s2625_s24 = sld [smem:[#allocation16_spill]]  ;;  %s2628_s21 = smov %s2042_s22 }
 0xa6d   : > { %s2626_s25 = sld [smem:[#allocation14_spill]] }
 0xa6e   : > { %s2627_s23 = sld [smem:[#allocation17_spill]] }
 0xa72   : > { %p29_p9 = scmp.ge.s32.totalorder %s2625_s24, 4  }
 0xa73   : > { %s2629_s22 = smov %s2626_s25 }
 0xa74   :  { %31 = sbr.rel (!%p29_p9) target bundleno = 11 (0xb), region = 147 }
 0xa79   :  { %1501 = vsyncpa [#allocation3], 1 }
 0xa7a   :  { %1503 = vsyncpa [#allocation3 + $0x1], 1 }
 0xa7b   :  { %1504 = vsyncpa [#allocation6], 1 }
 0xa7c   :  { %1506 = vsyncpa [#allocation6 + $0x1], 1 }
 0xa7d   :  { %1507 = vsyncpa [#allocation4], 1 }
 0xa7e   :  { %1509 = vsyncpa [#allocation4 + $0x1], 1 }

</bundles_post_ra>
